<compile_context>
chip_gen: v7x
topology: tpu7x:2x2x1
jax: 0.10.0
libtpu: 0.0.40
codegen_flags: <defaults>
</compile_context>

<pallas_src>
import functools

import jax
import jax.numpy as jnp
from jax.experimental import pallas as pl
from jax.experimental.pallas import tpu as pltpu


# ----------------------------------------------------------------------------
# Fused kernel: qkv linear -> multi-head attention -> proj linear
# ----------------------------------------------------------------------------
def _fused_attention_kernel(x_ref, wqkv_ref, bqkv_ref, wp_ref, bp_ref, o_ref, *,
                            num_heads, scale, add_qkv_bias):
    """One batch element per grid step.

    x_ref  : (1, N, C) bf16           o_ref : (1, N, C)
    wqkv   : (C, 3C) bf16             bqkv  : (1, 3C) f32
    wp     : (C, C)  bf16 (in, out)   bp    : (1, C)  f32
    """
    N = x_ref.shape[1]
    C = x_ref.shape[2]
    d = C // num_heads

    # ---- fused QKV projection: one lane-dense, full-depth MXU matmul -------
    x = x_ref[0]                                                  # (N, C) bf16
    qkv = jnp.dot(x, wqkv_ref[...],
                  preferred_element_type=jnp.float32)             # (N, 3C) f32
    if add_qkv_bias:
        qkv = qkv + bqkv_ref[...]

    # ---- per-head attention (static lane slices, 2-D dots only) ------------
    acc = None                                                    # (N, C) f32
    for h in range(num_heads):
        # Scale applied to q (O(N*d)) instead of to logits (O(N^2)).
        q = qkv[:, h * d:(h + 1) * d] * scale                     # (N, d) f32
        k = qkv[:, C + h * d: C + (h + 1) * d]                    # (N, d)
        v = qkv[:, 2 * C + h * d: 2 * C + (h + 1) * d]            # (N, d)

        logits = jnp.einsum("nd,md->nm",
                            q.astype(jnp.bfloat16), k.astype(jnp.bfloat16),
                            preferred_element_type=jnp.float32)   # (N, N) f32
        m = jnp.max(logits, axis=-1, keepdims=True)
        p = jnp.exp(logits - m)
        s = jnp.sum(p, axis=-1, keepdims=True)

        # Unnormalized context, then deferred normalization on (N, d) only.
        ctx = jnp.dot(p.astype(jnp.bfloat16), v.astype(jnp.bfloat16),
                      preferred_element_type=jnp.float32)         # (N, d) f32
        ctx = ctx * pl.reciprocal(s, approx=True)                 # EUP slot

        # Output projection: MXU-accumulated head reduction into (N, C).
        contrib = jnp.dot(ctx.astype(jnp.bfloat16),
                          wp_ref[h * d:(h + 1) * d, :],           # (d, C) bf16
                          preferred_element_type=jnp.float32)     # (N, C) f32
        acc = contrib if acc is None else acc + contrib

    o_ref[0] = (acc + bp_ref[...]).astype(o_ref.dtype)


# ----------------------------------------------------------------------------
# Parameter handling
# ----------------------------------------------------------------------------
def init_attention_params(key, dim, qkv_bias=False):
    """PyTorch-layout parameters: qkv.weight (3C, C), proj.weight (C, C)."""
    k1, k2, k3, k4 = jax.random.split(key, 4)
    bound = 1.0 / (dim ** 0.5)
    qkv_w = jax.random.uniform(k1, (3 * dim, dim), jnp.float32, -bound, bound)
    proj_w = jax.random.uniform(k2, (dim, dim), jnp.float32, -bound, bound)
    proj_b = jax.random.uniform(k3, (dim,), jnp.float32, -bound, bound)
    qkv_b = (jax.random.uniform(k4, (3 * dim,), jnp.float32, -bound, bound)
             if qkv_bias else None)
    return {"qkv_w": qkv_w, "qkv_b": qkv_b, "proj_w": proj_w, "proj_b": proj_b}


def prepare_attention_params(params, num_heads):
    """One-time rearrangement into lane-dense, pre-transposed bf16 weights."""
    qkv_w = params["qkv_w"]                 # (3C, C)  (out, in)
    proj_w = params["proj_w"]               # (C, C)
    proj_b = params["proj_b"]               # (C,)
    C = proj_w.shape[0]
    assert C % num_heads == 0

    # Fused qkv weight, (in, out) layout: column j = t*C + h*d + dd, exactly
    # matching the PyTorch Linear output ordering.
    w_qkv = qkv_w.T.astype(jnp.bfloat16)                  # (C, 3C)
    w_proj = proj_w.T.astype(jnp.bfloat16)                # (C, C) (in, out)

    if params["qkv_b"] is not None:
        b_qkv = params["qkv_b"].reshape(1, 3 * C).astype(jnp.float32)
        add_qkv_bias = True
    else:
        b_qkv = jnp.zeros((1, 3 * C), jnp.float32)
        add_qkv_bias = False

    return {
        "w_qkv": w_qkv,
        "b_qkv": b_qkv,
        "w_proj": w_proj,
        "b_proj": proj_b.reshape(1, C).astype(jnp.float32),
        "add_qkv_bias": add_qkv_bias,
    }


# ----------------------------------------------------------------------------
# Forward
# ----------------------------------------------------------------------------
def attention_forward(prepared, x, num_heads=8, qk_scale=None):
    """Pallas implementation of Attention.forward (mode=None path)."""
    B, N, C = x.shape
    d = C // num_heads
    scale = qk_scale if qk_scale is not None else d ** (-0.5)

    out_dtype = x.dtype
    # Cast activations to bf16 in the wrapper: halves x DMA bytes and removes
    # an in-kernel (N, C) convert.
    x_bf16 = x.astype(jnp.bfloat16)

    kernel = functools.partial(
        _fused_attention_kernel,
        num_heads=num_heads,
        scale=scale,
        add_qkv_bias=prepared["add_qkv_bias"],
    )

    return pl.pallas_call(
        kernel,
        out_shape=jax.ShapeDtypeStruct((B, N, C), out_dtype),
        grid=(B,),
        in_specs=[
            pl.BlockSpec((1, N, C), lambda b: (b, 0, 0)),       # x
            pl.BlockSpec((C, 3 * C), lambda b: (0, 0)),         # fused qkv W
            pl.BlockSpec((1, 3 * C), lambda b: (0, 0)),         # fused qkv b
            pl.BlockSpec((C, C), lambda b: (0, 0)),             # proj W
            pl.BlockSpec((1, C), lambda b: (0, 0)),             # proj b
        ],
        out_specs=pl.BlockSpec((1, N, C), lambda b: (b, 0, 0)),
        compiler_params=pltpu.CompilerParams(
            dimension_semantics=("parallel",),
            vmem_limit_bytes=64 * 1024 * 1024),
    )(x_bf16, prepared["w_qkv"], prepared["b_qkv"],
      prepared["w_proj"], prepared["b_proj"])


# ----------------------------------------------------------------------------
# Pure-JAX reference (f32) for sanity checking
# ----------------------------------------------------------------------------
def attention_reference(params, x, num_heads=8, qk_scale=None):
    B, N, C = x.shape
    head_dim = C // num_heads
    scale = qk_scale if qk_scale is not None else head_dim ** (-0.5)
    qkv = x @ params["qkv_w"].T
    if params["qkv_b"] is not None:
        qkv = qkv + params["qkv_b"]
    qkv = qkv.reshape(B, N, 3, num_heads, head_dim).transpose(2, 0, 3, 1, 4)
    q, k, v = qkv[0], qkv[1], qkv[2]
    logits = jnp.einsum("bhnd,bhmd->bhnm", q, k) * scale
    attn = jax.nn.softmax(logits, axis=-1)
    ctx = jnp.einsum("bhnm,bhmd->bhnd", attn, v)
    ctx = ctx.transpose(0, 2, 1, 3).reshape(B, N, C)
    return ctx @ params["proj_w"].T + params["proj_b"]


if __name__ == "__main__":
    # Small shapes consistent with the module: dim=32, num_heads=8 -> head_dim=4
    B, N, C = 2, 8, 32
    num_heads = 8

    key = jax.random.PRNGKey(0)
    kx, kp1, kp2 = jax.random.split(key, 3)
    x = jax.random.normal(kx, (B, N, C), jnp.float32)

    # --- default config (qkv_bias=False, default scale) ----------------------
    params = init_attention_params(kp1, C, qkv_bias=False)
    prepared = prepare_attention_params(params, num_heads)
    out = attention_forward(prepared, x, num_heads=num_heads)
    out = jax.block_until_ready(out)
    ref = attention_reference(params, x, num_heads=num_heads)
    assert out.shape == (B, N, C)
    err = float(jnp.max(jnp.abs(out - ref)))
    # bf16 MXU operands + approx reciprocal -> ~1e-2-level tolerance vs f32 ref
    assert jnp.allclose(out, ref, atol=3e-2, rtol=3e-2), f"mismatch (max |err|={err})"

    # --- qkv_bias=True with explicit qk_scale (exercises bias path) ----------
    params_b = init_attention_params(kp2, C, qkv_bias=True)
    prepared_b = prepare_attention_params(params_b, num_heads)
    out_b = attention_forward(prepared_b, x, num_heads=num_heads, qk_scale=0.3)
    out_b = jax.block_until_ready(out_b)
    ref_b = attention_reference(params_b, x, num_heads=num_heads, qk_scale=0.3)
    err_b = float(jnp.max(jnp.abs(out_b - ref_b)))
    assert jnp.allclose(out_b, ref_b, atol=3e-2, rtol=3e-2), \
        f"mismatch with bias (max |err|={err_b})"

    print("KERNEL_OK")
</pallas_src>

<mosaic_0001>
module attributes {stable_mosaic.version = 11 : i64} {
  func.func @_fused_attention_kernel(%arg0: i32, %arg1: memref<1x8x32xbf16, #tpu.memory_space<vmem>>, %arg2: memref<32x96xbf16, #tpu.memory_space<vmem>>, %arg3: memref<1x96xf32, #tpu.memory_space<vmem>>, %arg4: memref<32x32xbf16, #tpu.memory_space<vmem>>, %arg5: memref<1x32xf32, #tpu.memory_space<vmem>>, %arg6: memref<1x8x32xf32, #tpu.memory_space<vmem>>) attributes {dimension_semantics = [#tpu.dimension_semantics<parallel>], iteration_bounds = array<i64: 2>, scalar_prefetch = 0 : i64, scratch_operands = 0 : i64, tpu.core_type = #tpu.core_type<tc>, window_params = [{transform_indices = @transform_0, window_bounds = array<i64: 1, 8, 32>}, {pipeline_mode = #tpu.pipeline_mode<synchronous>, transform_indices = @transform_1, window_bounds = array<i64: 32, 96>}, {pipeline_mode = #tpu.pipeline_mode<synchronous>, transform_indices = @transform_2, window_bounds = array<i64: 1, 96>}, {pipeline_mode = #tpu.pipeline_mode<synchronous>, transform_indices = @transform_3, window_bounds = array<i64: 32, 32>}, {pipeline_mode = #tpu.pipeline_mode<synchronous>, transform_indices = @transform_4, window_bounds = array<i64: 1, 32>}, {transform_indices = @transform_5, window_bounds = array<i64: 1, 8, 32>}]} {
    %c0 = arith.constant 0 : index
    %c0_0 = arith.constant 0 : index
    %c0_1 = arith.constant 0 : index
    %0 = vector.load %arg1[%c0, %c0_0, %c0_1] : memref<1x8x32xbf16, #tpu.memory_space<vmem>>, vector<1x8x32xbf16>
    %1 = vector.shape_cast %0 : vector<1x8x32xbf16> to vector<8x32xbf16>
    %c0_2 = arith.constant 0 : index
    %c0_3 = arith.constant 0 : index
    %2 = vector.load %arg2[%c0_2, %c0_3] : memref<32x96xbf16, #tpu.memory_space<vmem>>, vector<32x96xbf16>
    %cst = arith.constant dense<0.000000e+00> : vector<8x96xf32>
    %3 = tpu.matmul %1, %2, %cst {dimension_numbers = #tpu.dot_dimension_numbers<[1], [0], [0], [1], [0, 0, 1, 1], [], []>} : vector<8x32xbf16>, vector<32x96xbf16>, vector<8x96xf32> -> vector<8x96xf32>
    %4 = vector.extract_strided_slice %3 {offsets = [0, 0], sizes = [8, 4], strides = [1, 1]} : vector<8x96xf32> to vector<8x4xf32>
    %cst_4 = arith.constant 5.000000e-01 : f32
    %5 = vector.broadcast %cst_4 : f32 to vector<8x4xf32>
    %6 = arith.mulf %4, %5 : vector<8x4xf32>
    %7 = vector.extract_strided_slice %3 {offsets = [0, 32], sizes = [8, 4], strides = [1, 1]} : vector<8x96xf32> to vector<8x4xf32>
    %8 = vector.extract_strided_slice %3 {offsets = [0, 64], sizes = [8, 4], strides = [1, 1]} : vector<8x96xf32> to vector<8x4xf32>
    %9 = arith.truncf %6 : vector<8x4xf32> to vector<8x4xbf16>
    %10 = arith.truncf %7 : vector<8x4xf32> to vector<8x4xbf16>
    "tpu.trace_start"() <{level = 10 : i32, message = "nd,md->nm"}> : () -> ()
    %cst_5 = arith.constant dense<0.000000e+00> : vector<8x8xf32>
    %11 = tpu.matmul %9, %10, %cst_5 {dimension_numbers = #tpu.dot_dimension_numbers<[1], [1], [0], [0], [0, 0, 1, 0], [], []>} : vector<8x4xbf16>, vector<8x4xbf16>, vector<8x8xf32> -> vector<8x8xf32>
    "tpu.trace_stop"() : () -> ()
    %cst_6 = arith.constant dense<0xFF800000> : vector<8xf32>
    %12 = vector.multi_reduction <maximumf>, %11, %cst_6 [1] : vector<8x8xf32> to vector<8xf32>
    %13 = vector.shape_cast %12 : vector<8xf32> to vector<8x1xf32>
    %14 = vector.broadcast %13 : vector<8x1xf32> to vector<8x8xf32>
    %15 = arith.subf %11, %14 : vector<8x8xf32>
    %16 = math.exp %15 : vector<8x8xf32>
    %cst_7 = arith.constant dense<0.000000e+00> : vector<8xf32>
    %17 = vector.multi_reduction <add>, %16, %cst_7 [1] : vector<8x8xf32> to vector<8xf32>
    %18 = vector.shape_cast %17 : vector<8xf32> to vector<8x1xf32>
    %19 = arith.truncf %16 : vector<8x8xf32> to vector<8x8xbf16>
    %20 = arith.truncf %8 : vector<8x4xf32> to vector<8x4xbf16>
    %cst_8 = arith.constant dense<0.000000e+00> : vector<8x4xf32>
    %21 = tpu.matmul %19, %20, %cst_8 {dimension_numbers = #tpu.dot_dimension_numbers<[1], [0], [0], [1], [0, 0, 1, 1], [], []>} : vector<8x8xbf16>, vector<8x4xbf16>, vector<8x4xf32> -> vector<8x4xf32>
    %22 = tpu.reciprocal %18 {approx = true} : vector<8x1xf32> -> vector<8x1xf32>
    %23 = vector.broadcast %22 : vector<8x1xf32> to vector<8x4xf32>
    %24 = arith.mulf %21, %23 : vector<8x4xf32>
    %25 = arith.truncf %24 : vector<8x4xf32> to vector<8x4xbf16>
    %c0_9 = arith.constant 0 : index
    %c0_10 = arith.constant 0 : index
    %26 = vector.load %arg4[%c0_9, %c0_10] : memref<32x32xbf16, #tpu.memory_space<vmem>>, vector<4x32xbf16>
    %cst_11 = arith.constant dense<0.000000e+00> : vector<8x32xf32>
    %27 = tpu.matmul %25, %26, %cst_11 {dimension_numbers = #tpu.dot_dimension_numbers<[1], [0], [0], [1], [0, 0, 1, 1], [], []>} : vector<8x4xbf16>, vector<4x32xbf16>, vector<8x32xf32> -> vector<8x32xf32>
    %28 = vector.extract_strided_slice %3 {offsets = [0, 4], sizes = [8, 4], strides = [1, 1]} : vector<8x96xf32> to vector<8x4xf32>
    %cst_12 = arith.constant 5.000000e-01 : f32
    %29 = vector.broadcast %cst_12 : f32 to vector<8x4xf32>
    %30 = arith.mulf %28, %29 : vector<8x4xf32>
    %31 = vector.extract_strided_slice %3 {offsets = [0, 36], sizes = [8, 4], strides = [1, 1]} : vector<8x96xf32> to vector<8x4xf32>
    %32 = vector.extract_strided_slice %3 {offsets = [0, 68], sizes = [8, 4], strides = [1, 1]} : vector<8x96xf32> to vector<8x4xf32>
    %33 = arith.truncf %30 : vector<8x4xf32> to vector<8x4xbf16>
    %34 = arith.truncf %31 : vector<8x4xf32> to vector<8x4xbf16>
    "tpu.trace_start"() <{level = 10 : i32, message = "nd,md->nm"}> : () -> ()
    %cst_13 = arith.constant dense<0.000000e+00> : vector<8x8xf32>
    %35 = tpu.matmul %33, %34, %cst_13 {dimension_numbers = #tpu.dot_dimension_numbers<[1], [1], [0], [0], [0, 0, 1, 0], [], []>} : vector<8x4xbf16>, vector<8x4xbf16>, vector<8x8xf32> -> vector<8x8xf32>
    "tpu.trace_stop"() : () -> ()
    %cst_14 = arith.constant dense<0xFF800000> : vector<8xf32>
    %36 = vector.multi_reduction <maximumf>, %35, %cst_14 [1] : vector<8x8xf32> to vector<8xf32>
    %37 = vector.shape_cast %36 : vector<8xf32> to vector<8x1xf32>
    %38 = vector.broadcast %37 : vector<8x1xf32> to vector<8x8xf32>
    %39 = arith.subf %35, %38 : vector<8x8xf32>
    %40 = math.exp %39 : vector<8x8xf32>
    %cst_15 = arith.constant dense<0.000000e+00> : vector<8xf32>
    %41 = vector.multi_reduction <add>, %40, %cst_15 [1] : vector<8x8xf32> to vector<8xf32>
    %42 = vector.shape_cast %41 : vector<8xf32> to vector<8x1xf32>
    %43 = arith.truncf %40 : vector<8x8xf32> to vector<8x8xbf16>
    %44 = arith.truncf %32 : vector<8x4xf32> to vector<8x4xbf16>
    %cst_16 = arith.constant dense<0.000000e+00> : vector<8x4xf32>
    %45 = tpu.matmul %43, %44, %cst_16 {dimension_numbers = #tpu.dot_dimension_numbers<[1], [0], [0], [1], [0, 0, 1, 1], [], []>} : vector<8x8xbf16>, vector<8x4xbf16>, vector<8x4xf32> -> vector<8x4xf32>
    %46 = tpu.reciprocal %42 {approx = true} : vector<8x1xf32> -> vector<8x1xf32>
    %47 = vector.broadcast %46 : vector<8x1xf32> to vector<8x4xf32>
    %48 = arith.mulf %45, %47 : vector<8x4xf32>
    %49 = arith.truncf %48 : vector<8x4xf32> to vector<8x4xbf16>
    %c4 = arith.constant 4 : index
    %c0_17 = arith.constant 0 : index
    %50 = vector.load %arg4[%c4, %c0_17] : memref<32x32xbf16, #tpu.memory_space<vmem>>, vector<4x32xbf16>
    %cst_18 = arith.constant dense<0.000000e+00> : vector<8x32xf32>
    %51 = tpu.matmul %49, %50, %cst_18 {dimension_numbers = #tpu.dot_dimension_numbers<[1], [0], [0], [1], [0, 0, 1, 1], [], []>} : vector<8x4xbf16>, vector<4x32xbf16>, vector<8x32xf32> -> vector<8x32xf32>
    %52 = arith.addf %27, %51 : vector<8x32xf32>
    %53 = vector.extract_strided_slice %3 {offsets = [0, 8], sizes = [8, 4], strides = [1, 1]} : vector<8x96xf32> to vector<8x4xf32>
    %cst_19 = arith.constant 5.000000e-01 : f32
    %54 = vector.broadcast %cst_19 : f32 to vector<8x4xf32>
    %55 = arith.mulf %53, %54 : vector<8x4xf32>
    %56 = vector.extract_strided_slice %3 {offsets = [0, 40], sizes = [8, 4], strides = [1, 1]} : vector<8x96xf32> to vector<8x4xf32>
    %57 = vector.extract_strided_slice %3 {offsets = [0, 72], sizes = [8, 4], strides = [1, 1]} : vector<8x96xf32> to vector<8x4xf32>
    %58 = arith.truncf %55 : vector<8x4xf32> to vector<8x4xbf16>
    %59 = arith.truncf %56 : vector<8x4xf32> to vector<8x4xbf16>
    "tpu.trace_start"() <{level = 10 : i32, message = "nd,md->nm"}> : () -> ()
    %cst_20 = arith.constant dense<0.000000e+00> : vector<8x8xf32>
    %60 = tpu.matmul %58, %59, %cst_20 {dimension_numbers = #tpu.dot_dimension_numbers<[1], [1], [0], [0], [0, 0, 1, 0], [], []>} : vector<8x4xbf16>, vector<8x4xbf16>, vector<8x8xf32> -> vector<8x8xf32>
    "tpu.trace_stop"() : () -> ()
    %cst_21 = arith.constant dense<0xFF800000> : vector<8xf32>
    %61 = vector.multi_reduction <maximumf>, %60, %cst_21 [1] : vector<8x8xf32> to vector<8xf32>
    %62 = vector.shape_cast %61 : vector<8xf32> to vector<8x1xf32>
    %63 = vector.broadcast %62 : vector<8x1xf32> to vector<8x8xf32>
    %64 = arith.subf %60, %63 : vector<8x8xf32>
    %65 = math.exp %64 : vector<8x8xf32>
    %cst_22 = arith.constant dense<0.000000e+00> : vector<8xf32>
    %66 = vector.multi_reduction <add>, %65, %cst_22 [1] : vector<8x8xf32> to vector<8xf32>
    %67 = vector.shape_cast %66 : vector<8xf32> to vector<8x1xf32>
    %68 = arith.truncf %65 : vector<8x8xf32> to vector<8x8xbf16>
    %69 = arith.truncf %57 : vector<8x4xf32> to vector<8x4xbf16>
    %cst_23 = arith.constant dense<0.000000e+00> : vector<8x4xf32>
    %70 = tpu.matmul %68, %69, %cst_23 {dimension_numbers = #tpu.dot_dimension_numbers<[1], [0], [0], [1], [0, 0, 1, 1], [], []>} : vector<8x8xbf16>, vector<8x4xbf16>, vector<8x4xf32> -> vector<8x4xf32>
    %71 = tpu.reciprocal %67 {approx = true} : vector<8x1xf32> -> vector<8x1xf32>
    %72 = vector.broadcast %71 : vector<8x1xf32> to vector<8x4xf32>
    %73 = arith.mulf %70, %72 : vector<8x4xf32>
    %74 = arith.truncf %73 : vector<8x4xf32> to vector<8x4xbf16>
    %c8 = arith.constant 8 : index
    %c0_24 = arith.constant 0 : index
    %75 = vector.load %arg4[%c8, %c0_24] : memref<32x32xbf16, #tpu.memory_space<vmem>>, vector<4x32xbf16>
    %cst_25 = arith.constant dense<0.000000e+00> : vector<8x32xf32>
    %76 = tpu.matmul %74, %75, %cst_25 {dimension_numbers = #tpu.dot_dimension_numbers<[1], [0], [0], [1], [0, 0, 1, 1], [], []>} : vector<8x4xbf16>, vector<4x32xbf16>, vector<8x32xf32> -> vector<8x32xf32>
    %77 = arith.addf %52, %76 : vector<8x32xf32>
    %78 = vector.extract_strided_slice %3 {offsets = [0, 12], sizes = [8, 4], strides = [1, 1]} : vector<8x96xf32> to vector<8x4xf32>
    %cst_26 = arith.constant 5.000000e-01 : f32
    %79 = vector.broadcast %cst_26 : f32 to vector<8x4xf32>
    %80 = arith.mulf %78, %79 : vector<8x4xf32>
    %81 = vector.extract_strided_slice %3 {offsets = [0, 44], sizes = [8, 4], strides = [1, 1]} : vector<8x96xf32> to vector<8x4xf32>
    %82 = vector.extract_strided_slice %3 {offsets = [0, 76], sizes = [8, 4], strides = [1, 1]} : vector<8x96xf32> to vector<8x4xf32>
    %83 = arith.truncf %80 : vector<8x4xf32> to vector<8x4xbf16>
    %84 = arith.truncf %81 : vector<8x4xf32> to vector<8x4xbf16>
    "tpu.trace_start"() <{level = 10 : i32, message = "nd,md->nm"}> : () -> ()
    %cst_27 = arith.constant dense<0.000000e+00> : vector<8x8xf32>
    %85 = tpu.matmul %83, %84, %cst_27 {dimension_numbers = #tpu.dot_dimension_numbers<[1], [1], [0], [0], [0, 0, 1, 0], [], []>} : vector<8x4xbf16>, vector<8x4xbf16>, vector<8x8xf32> -> vector<8x8xf32>
    "tpu.trace_stop"() : () -> ()
    %cst_28 = arith.constant dense<0xFF800000> : vector<8xf32>
    %86 = vector.multi_reduction <maximumf>, %85, %cst_28 [1] : vector<8x8xf32> to vector<8xf32>
    %87 = vector.shape_cast %86 : vector<8xf32> to vector<8x1xf32>
    %88 = vector.broadcast %87 : vector<8x1xf32> to vector<8x8xf32>
    %89 = arith.subf %85, %88 : vector<8x8xf32>
    %90 = math.exp %89 : vector<8x8xf32>
    %cst_29 = arith.constant dense<0.000000e+00> : vector<8xf32>
    %91 = vector.multi_reduction <add>, %90, %cst_29 [1] : vector<8x8xf32> to vector<8xf32>
    %92 = vector.shape_cast %91 : vector<8xf32> to vector<8x1xf32>
    %93 = arith.truncf %90 : vector<8x8xf32> to vector<8x8xbf16>
    %94 = arith.truncf %82 : vector<8x4xf32> to vector<8x4xbf16>
    %cst_30 = arith.constant dense<0.000000e+00> : vector<8x4xf32>
    %95 = tpu.matmul %93, %94, %cst_30 {dimension_numbers = #tpu.dot_dimension_numbers<[1], [0], [0], [1], [0, 0, 1, 1], [], []>} : vector<8x8xbf16>, vector<8x4xbf16>, vector<8x4xf32> -> vector<8x4xf32>
    %96 = tpu.reciprocal %92 {approx = true} : vector<8x1xf32> -> vector<8x1xf32>
    %97 = vector.broadcast %96 : vector<8x1xf32> to vector<8x4xf32>
    %98 = arith.mulf %95, %97 : vector<8x4xf32>
    %99 = arith.truncf %98 : vector<8x4xf32> to vector<8x4xbf16>
    %c12 = arith.constant 12 : index
    %c0_31 = arith.constant 0 : index
    %100 = vector.load %arg4[%c12, %c0_31] : memref<32x32xbf16, #tpu.memory_space<vmem>>, vector<4x32xbf16>
    %cst_32 = arith.constant dense<0.000000e+00> : vector<8x32xf32>
    %101 = tpu.matmul %99, %100, %cst_32 {dimension_numbers = #tpu.dot_dimension_numbers<[1], [0], [0], [1], [0, 0, 1, 1], [], []>} : vector<8x4xbf16>, vector<4x32xbf16>, vector<8x32xf32> -> vector<8x32xf32>
    %102 = arith.addf %77, %101 : vector<8x32xf32>
    %103 = vector.extract_strided_slice %3 {offsets = [0, 16], sizes = [8, 4], strides = [1, 1]} : vector<8x96xf32> to vector<8x4xf32>
    %cst_33 = arith.constant 5.000000e-01 : f32
    %104 = vector.broadcast %cst_33 : f32 to vector<8x4xf32>
    %105 = arith.mulf %103, %104 : vector<8x4xf32>
    %106 = vector.extract_strided_slice %3 {offsets = [0, 48], sizes = [8, 4], strides = [1, 1]} : vector<8x96xf32> to vector<8x4xf32>
    %107 = vector.extract_strided_slice %3 {offsets = [0, 80], sizes = [8, 4], strides = [1, 1]} : vector<8x96xf32> to vector<8x4xf32>
    %108 = arith.truncf %105 : vector<8x4xf32> to vector<8x4xbf16>
    %109 = arith.truncf %106 : vector<8x4xf32> to vector<8x4xbf16>
    "tpu.trace_start"() <{level = 10 : i32, message = "nd,md->nm"}> : () -> ()
    %cst_34 = arith.constant dense<0.000000e+00> : vector<8x8xf32>
    %110 = tpu.matmul %108, %109, %cst_34 {dimension_numbers = #tpu.dot_dimension_numbers<[1], [1], [0], [0], [0, 0, 1, 0], [], []>} : vector<8x4xbf16>, vector<8x4xbf16>, vector<8x8xf32> -> vector<8x8xf32>
    "tpu.trace_stop"() : () -> ()
    %cst_35 = arith.constant dense<0xFF800000> : vector<8xf32>
    %111 = vector.multi_reduction <maximumf>, %110, %cst_35 [1] : vector<8x8xf32> to vector<8xf32>
    %112 = vector.shape_cast %111 : vector<8xf32> to vector<8x1xf32>
    %113 = vector.broadcast %112 : vector<8x1xf32> to vector<8x8xf32>
    %114 = arith.subf %110, %113 : vector<8x8xf32>
    %115 = math.exp %114 : vector<8x8xf32>
    %cst_36 = arith.constant dense<0.000000e+00> : vector<8xf32>
    %116 = vector.multi_reduction <add>, %115, %cst_36 [1] : vector<8x8xf32> to vector<8xf32>
    %117 = vector.shape_cast %116 : vector<8xf32> to vector<8x1xf32>
    %118 = arith.truncf %115 : vector<8x8xf32> to vector<8x8xbf16>
    %119 = arith.truncf %107 : vector<8x4xf32> to vector<8x4xbf16>
    %cst_37 = arith.constant dense<0.000000e+00> : vector<8x4xf32>
    %120 = tpu.matmul %118, %119, %cst_37 {dimension_numbers = #tpu.dot_dimension_numbers<[1], [0], [0], [1], [0, 0, 1, 1], [], []>} : vector<8x8xbf16>, vector<8x4xbf16>, vector<8x4xf32> -> vector<8x4xf32>
    %121 = tpu.reciprocal %117 {approx = true} : vector<8x1xf32> -> vector<8x1xf32>
    %122 = vector.broadcast %121 : vector<8x1xf32> to vector<8x4xf32>
    %123 = arith.mulf %120, %122 : vector<8x4xf32>
    %124 = arith.truncf %123 : vector<8x4xf32> to vector<8x4xbf16>
    %c16 = arith.constant 16 : index
    %c0_38 = arith.constant 0 : index
    %125 = vector.load %arg4[%c16, %c0_38] : memref<32x32xbf16, #tpu.memory_space<vmem>>, vector<4x32xbf16>
    %cst_39 = arith.constant dense<0.000000e+00> : vector<8x32xf32>
    %126 = tpu.matmul %124, %125, %cst_39 {dimension_numbers = #tpu.dot_dimension_numbers<[1], [0], [0], [1], [0, 0, 1, 1], [], []>} : vector<8x4xbf16>, vector<4x32xbf16>, vector<8x32xf32> -> vector<8x32xf32>
    %127 = arith.addf %102, %126 : vector<8x32xf32>
    %128 = vector.extract_strided_slice %3 {offsets = [0, 20], sizes = [8, 4], strides = [1, 1]} : vector<8x96xf32> to vector<8x4xf32>
    %cst_40 = arith.constant 5.000000e-01 : f32
    %129 = vector.broadcast %cst_40 : f32 to vector<8x4xf32>
    %130 = arith.mulf %128, %129 : vector<8x4xf32>
    %131 = vector.extract_strided_slice %3 {offsets = [0, 52], sizes = [8, 4], strides = [1, 1]} : vector<8x96xf32> to vector<8x4xf32>
    %132 = vector.extract_strided_slice %3 {offsets = [0, 84], sizes = [8, 4], strides = [1, 1]} : vector<8x96xf32> to vector<8x4xf32>
    %133 = arith.truncf %130 : vector<8x4xf32> to vector<8x4xbf16>
    %134 = arith.truncf %131 : vector<8x4xf32> to vector<8x4xbf16>
    "tpu.trace_start"() <{level = 10 : i32, message = "nd,md->nm"}> : () -> ()
    %cst_41 = arith.constant dense<0.000000e+00> : vector<8x8xf32>
    %135 = tpu.matmul %133, %134, %cst_41 {dimension_numbers = #tpu.dot_dimension_numbers<[1], [1], [0], [0], [0, 0, 1, 0], [], []>} : vector<8x4xbf16>, vector<8x4xbf16>, vector<8x8xf32> -> vector<8x8xf32>
    "tpu.trace_stop"() : () -> ()
    %cst_42 = arith.constant dense<0xFF800000> : vector<8xf32>
    %136 = vector.multi_reduction <maximumf>, %135, %cst_42 [1] : vector<8x8xf32> to vector<8xf32>
    %137 = vector.shape_cast %136 : vector<8xf32> to vector<8x1xf32>
    %138 = vector.broadcast %137 : vector<8x1xf32> to vector<8x8xf32>
    %139 = arith.subf %135, %138 : vector<8x8xf32>
    %140 = math.exp %139 : vector<8x8xf32>
    %cst_43 = arith.constant dense<0.000000e+00> : vector<8xf32>
    %141 = vector.multi_reduction <add>, %140, %cst_43 [1] : vector<8x8xf32> to vector<8xf32>
    %142 = vector.shape_cast %141 : vector<8xf32> to vector<8x1xf32>
    %143 = arith.truncf %140 : vector<8x8xf32> to vector<8x8xbf16>
    %144 = arith.truncf %132 : vector<8x4xf32> to vector<8x4xbf16>
    %cst_44 = arith.constant dense<0.000000e+00> : vector<8x4xf32>
    %145 = tpu.matmul %143, %144, %cst_44 {dimension_numbers = #tpu.dot_dimension_numbers<[1], [0], [0], [1], [0, 0, 1, 1], [], []>} : vector<8x8xbf16>, vector<8x4xbf16>, vector<8x4xf32> -> vector<8x4xf32>
    %146 = tpu.reciprocal %142 {approx = true} : vector<8x1xf32> -> vector<8x1xf32>
    %147 = vector.broadcast %146 : vector<8x1xf32> to vector<8x4xf32>
    %148 = arith.mulf %145, %147 : vector<8x4xf32>
    %149 = arith.truncf %148 : vector<8x4xf32> to vector<8x4xbf16>
    %c20 = arith.constant 20 : index
    %c0_45 = arith.constant 0 : index
    %150 = vector.load %arg4[%c20, %c0_45] : memref<32x32xbf16, #tpu.memory_space<vmem>>, vector<4x32xbf16>
    %cst_46 = arith.constant dense<0.000000e+00> : vector<8x32xf32>
    %151 = tpu.matmul %149, %150, %cst_46 {dimension_numbers = #tpu.dot_dimension_numbers<[1], [0], [0], [1], [0, 0, 1, 1], [], []>} : vector<8x4xbf16>, vector<4x32xbf16>, vector<8x32xf32> -> vector<8x32xf32>
    %152 = arith.addf %127, %151 : vector<8x32xf32>
    %153 = vector.extract_strided_slice %3 {offsets = [0, 24], sizes = [8, 4], strides = [1, 1]} : vector<8x96xf32> to vector<8x4xf32>
    %cst_47 = arith.constant 5.000000e-01 : f32
    %154 = vector.broadcast %cst_47 : f32 to vector<8x4xf32>
    %155 = arith.mulf %153, %154 : vector<8x4xf32>
    %156 = vector.extract_strided_slice %3 {offsets = [0, 56], sizes = [8, 4], strides = [1, 1]} : vector<8x96xf32> to vector<8x4xf32>
    %157 = vector.extract_strided_slice %3 {offsets = [0, 88], sizes = [8, 4], strides = [1, 1]} : vector<8x96xf32> to vector<8x4xf32>
    %158 = arith.truncf %155 : vector<8x4xf32> to vector<8x4xbf16>
    %159 = arith.truncf %156 : vector<8x4xf32> to vector<8x4xbf16>
    "tpu.trace_start"() <{level = 10 : i32, message = "nd,md->nm"}> : () -> ()
    %cst_48 = arith.constant dense<0.000000e+00> : vector<8x8xf32>
    %160 = tpu.matmul %158, %159, %cst_48 {dimension_numbers = #tpu.dot_dimension_numbers<[1], [1], [0], [0], [0, 0, 1, 0], [], []>} : vector<8x4xbf16>, vector<8x4xbf16>, vector<8x8xf32> -> vector<8x8xf32>
    "tpu.trace_stop"() : () -> ()
    %cst_49 = arith.constant dense<0xFF800000> : vector<8xf32>
    %161 = vector.multi_reduction <maximumf>, %160, %cst_49 [1] : vector<8x8xf32> to vector<8xf32>
    %162 = vector.shape_cast %161 : vector<8xf32> to vector<8x1xf32>
    %163 = vector.broadcast %162 : vector<8x1xf32> to vector<8x8xf32>
    %164 = arith.subf %160, %163 : vector<8x8xf32>
    %165 = math.exp %164 : vector<8x8xf32>
    %cst_50 = arith.constant dense<0.000000e+00> : vector<8xf32>
    %166 = vector.multi_reduction <add>, %165, %cst_50 [1] : vector<8x8xf32> to vector<8xf32>
    %167 = vector.shape_cast %166 : vector<8xf32> to vector<8x1xf32>
    %168 = arith.truncf %165 : vector<8x8xf32> to vector<8x8xbf16>
    %169 = arith.truncf %157 : vector<8x4xf32> to vector<8x4xbf16>
    %cst_51 = arith.constant dense<0.000000e+00> : vector<8x4xf32>
    %170 = tpu.matmul %168, %169, %cst_51 {dimension_numbers = #tpu.dot_dimension_numbers<[1], [0], [0], [1], [0, 0, 1, 1], [], []>} : vector<8x8xbf16>, vector<8x4xbf16>, vector<8x4xf32> -> vector<8x4xf32>
    %171 = tpu.reciprocal %167 {approx = true} : vector<8x1xf32> -> vector<8x1xf32>
    %172 = vector.broadcast %171 : vector<8x1xf32> to vector<8x4xf32>
    %173 = arith.mulf %170, %172 : vector<8x4xf32>
    %174 = arith.truncf %173 : vector<8x4xf32> to vector<8x4xbf16>
    %c24 = arith.constant 24 : index
    %c0_52 = arith.constant 0 : index
    %175 = vector.load %arg4[%c24, %c0_52] : memref<32x32xbf16, #tpu.memory_space<vmem>>, vector<4x32xbf16>
    %cst_53 = arith.constant dense<0.000000e+00> : vector<8x32xf32>
    %176 = tpu.matmul %174, %175, %cst_53 {dimension_numbers = #tpu.dot_dimension_numbers<[1], [0], [0], [1], [0, 0, 1, 1], [], []>} : vector<8x4xbf16>, vector<4x32xbf16>, vector<8x32xf32> -> vector<8x32xf32>
    %177 = arith.addf %152, %176 : vector<8x32xf32>
    %178 = vector.extract_strided_slice %3 {offsets = [0, 28], sizes = [8, 4], strides = [1, 1]} : vector<8x96xf32> to vector<8x4xf32>
    %cst_54 = arith.constant 5.000000e-01 : f32
    %179 = vector.broadcast %cst_54 : f32 to vector<8x4xf32>
    %180 = arith.mulf %178, %179 : vector<8x4xf32>
    %181 = vector.extract_strided_slice %3 {offsets = [0, 60], sizes = [8, 4], strides = [1, 1]} : vector<8x96xf32> to vector<8x4xf32>
    %182 = vector.extract_strided_slice %3 {offsets = [0, 92], sizes = [8, 4], strides = [1, 1]} : vector<8x96xf32> to vector<8x4xf32>
    %183 = arith.truncf %180 : vector<8x4xf32> to vector<8x4xbf16>
    %184 = arith.truncf %181 : vector<8x4xf32> to vector<8x4xbf16>
    "tpu.trace_start"() <{level = 10 : i32, message = "nd,md->nm"}> : () -> ()
    %cst_55 = arith.constant dense<0.000000e+00> : vector<8x8xf32>
    %185 = tpu.matmul %183, %184, %cst_55 {dimension_numbers = #tpu.dot_dimension_numbers<[1], [1], [0], [0], [0, 0, 1, 0], [], []>} : vector<8x4xbf16>, vector<8x4xbf16>, vector<8x8xf32> -> vector<8x8xf32>
    "tpu.trace_stop"() : () -> ()
    %cst_56 = arith.constant dense<0xFF800000> : vector<8xf32>
    %186 = vector.multi_reduction <maximumf>, %185, %cst_56 [1] : vector<8x8xf32> to vector<8xf32>
    %187 = vector.shape_cast %186 : vector<8xf32> to vector<8x1xf32>
    %188 = vector.broadcast %187 : vector<8x1xf32> to vector<8x8xf32>
    %189 = arith.subf %185, %188 : vector<8x8xf32>
    %190 = math.exp %189 : vector<8x8xf32>
    %cst_57 = arith.constant dense<0.000000e+00> : vector<8xf32>
    %191 = vector.multi_reduction <add>, %190, %cst_57 [1] : vector<8x8xf32> to vector<8xf32>
    %192 = vector.shape_cast %191 : vector<8xf32> to vector<8x1xf32>
    %193 = arith.truncf %190 : vector<8x8xf32> to vector<8x8xbf16>
    %194 = arith.truncf %182 : vector<8x4xf32> to vector<8x4xbf16>
    %cst_58 = arith.constant dense<0.000000e+00> : vector<8x4xf32>
    %195 = tpu.matmul %193, %194, %cst_58 {dimension_numbers = #tpu.dot_dimension_numbers<[1], [0], [0], [1], [0, 0, 1, 1], [], []>} : vector<8x8xbf16>, vector<8x4xbf16>, vector<8x4xf32> -> vector<8x4xf32>
    %196 = tpu.reciprocal %192 {approx = true} : vector<8x1xf32> -> vector<8x1xf32>
    %197 = vector.broadcast %196 : vector<8x1xf32> to vector<8x4xf32>
    %198 = arith.mulf %195, %197 : vector<8x4xf32>
    %199 = arith.truncf %198 : vector<8x4xf32> to vector<8x4xbf16>
    %c28 = arith.constant 28 : index
    %c0_59 = arith.constant 0 : index
    %200 = vector.load %arg4[%c28, %c0_59] : memref<32x32xbf16, #tpu.memory_space<vmem>>, vector<4x32xbf16>
    %cst_60 = arith.constant dense<0.000000e+00> : vector<8x32xf32>
    %201 = tpu.matmul %199, %200, %cst_60 {dimension_numbers = #tpu.dot_dimension_numbers<[1], [0], [0], [1], [0, 0, 1, 1], [], []>} : vector<8x4xbf16>, vector<4x32xbf16>, vector<8x32xf32> -> vector<8x32xf32>
    %202 = arith.addf %177, %201 : vector<8x32xf32>
    %c0_61 = arith.constant 0 : index
    %c0_62 = arith.constant 0 : index
    %203 = vector.load %arg5[%c0_61, %c0_62] : memref<1x32xf32, #tpu.memory_space<vmem>>, vector<1x32xf32>
    %204 = vector.broadcast %203 : vector<1x32xf32> to vector<8x32xf32>
    %205 = arith.addf %202, %204 : vector<8x32xf32>
    %c0_63 = arith.constant 0 : index
    %c0_64 = arith.constant 0 : index
    %c0_65 = arith.constant 0 : index
    %206 = vector.load %arg6[%c0_63, %c0_64, %c0_65] : memref<1x8x32xf32, #tpu.memory_space<vmem>>, vector<1x8x32xf32>
    %207 = vector.shape_cast %206 : vector<1x8x32xf32> to vector<8x32xf32>
    %208 = vector.shape_cast %205 : vector<8x32xf32> to vector<1x8x32xf32>
    tpu.vector_store %arg6[%c0_63, %c0_64, %c0_65], %208 {strides = array<i32>} : memref<1x8x32xf32, #tpu.memory_space<vmem>>, vector<1x8x32xf32>,
    return
  }
  func.func @transform_0(%arg0: i32) -> (i32, i32, i32) {
    %c0_i32 = arith.constant 0 : i32
    %c0_i32_0 = arith.constant 0 : i32
    %c0_i32_1 = arith.constant 0 : i32
    return %arg0, %c0_i32, %c0_i32_0 : i32, i32, i32
  }
  func.func @transform_1(%arg0: i32) -> (i32, i32) {
    %c0_i32 = arith.constant 0 : i32
    %c0_i32_0 = arith.constant 0 : i32
    %c0_i32_1 = arith.constant 0 : i32
    return %c0_i32, %c0_i32_0 : i32, i32
  }
  func.func @transform_2(%arg0: i32) -> (i32, i32) {
    %c0_i32 = arith.constant 0 : i32
    %c0_i32_0 = arith.constant 0 : i32
    %c0_i32_1 = arith.constant 0 : i32
    return %c0_i32, %c0_i32_0 : i32, i32
  }
  func.func @transform_3(%arg0: i32) -> (i32, i32) {
    %c0_i32 = arith.constant 0 : i32
    %c0_i32_0 = arith.constant 0 : i32
    %c0_i32_1 = arith.constant 0 : i32
    return %c0_i32, %c0_i32_0 : i32, i32
  }
  func.func @transform_4(%arg0: i32) -> (i32, i32) {
    %c0_i32 = arith.constant 0 : i32
    %c0_i32_0 = arith.constant 0 : i32
    %c0_i32_1 = arith.constant 0 : i32
    return %c0_i32, %c0_i32_0 : i32, i32
  }
  func.func @transform_5(%arg0: i32) -> (i32, i32, i32) {
    %c0_i32 = arith.constant 0 : i32
    %c0_i32_0 = arith.constant 0 : i32
    %c0_i32_1 = arith.constant 0 : i32
    return %arg0, %c0_i32, %c0_i32_0 : i32, i32, i32
  }
}

</mosaic_0001>

<bundles_post_ra>
// kernel: tpu_custom_call.1
= control target key start
LH: loop header
LB: loop body
LE: loop exit
PB: predicated region body
PF: predicated region fallthrough
CT: control target
= control target key end

     0   :  { %10 = vsyncpa [#allocation3], 0  ;;  %s2923_s0 = inlined_call_operand.hbm [shape: bf16[2,8,32], index: 0, kind: input, shape index: {}]   ;;  %s2924_s1 = inlined_call_operand.hbm [shape: bf16[32,96], index: 1, kind: input, shape index: {}]   ;;  %s2925_s2 = inlined_call_operand.hbm [shape: f32[1,96], index: 2, kind: input, shape index: {}]   ;;  %s2926_s3 = inlined_call_operand.hbm [shape: bf16[32,32], index: 3, kind: input, shape index: {}]   ;;  %s2927_s4 = inlined_call_operand.hbm [shape: f32[1,32], index: 4, kind: input, shape index: {}]   ;;  %s2928_s5 = inlined_call_operand.hbm [shape: f32[2,8,32], index: 5, kind: output, shape index: {}]  }
   0x1   :  { %12 = vsyncpa [#allocation3 + $0x1], 0 }
   0x2   :  { %13 = vsyncpa [#allocation6], 0 }
   0x3   :  { %14 = vsyncpa [#allocation9], 0 }
   0x4   :  { %15 = vsyncpa [#allocation4], 0 }
   0x5   :  { %17 = vsyncpa [#allocation4 + $0x1], 0  ;;  %s2468_s18 = smov 0   ;;  %s2470_s19 = smov 0  }
   0x6   :  { %s2472_s20 = smov 0   ;;  %s2474_s21 = smov 0  }
   0x7 LB: > { %s2405_s22 = smov [#allocation5]   ;;  %s2489_s24 = sadd.s32 4294967295, %s2403_s21   ;;  %s2403_s21 = sphi %s2474_s21, %s2952_s21   ;;  %s2399_s20 = sphi %s2472_s20, %s2951_s20   ;;  %s2395_s19 = sphi %s2470_s19, %s2950_s19   ;;  %s2391_s18 = sphi %s2468_s18, %s2949_s18  }
   0x8   : > { %s176_s23 = sshll.u32 %s2405_s22, 4  ;;  %p1781_p0 = scmp.ge.s32.totalorder %s2403_s21, 1  ;;  %s2494_s23 = int_to_ptr.vmem [resolvable:$true] %s176_s23 }
   0x9   : > { %p2929_p1 = scmp.eq.s32.totalorder %s2489_s24, 0  ;;  %p164_p2 = scmp.lt.s32.totalorder %s2403_s21, 3 }
   0xa   : > { %s2406_s26 = smov [#allocation8]   ;;  %s2407_s29 = smov [#allocation7]  }
   0xb   : > { %p2496_p3 = pnand %p1781_p0, %p164_p2  ;;  %s200_s27 = sshll.u32 %s2406_s26, 4  ;;  %s2509_s27 = int_to_ptr.vmem [resolvable:$true] %s200_s27 }
   0xc   : > { %s190_s30 = sshll.u32 %s2407_s29, 4  ;;  %s2187_s8 = scalar_lea.hbm %s2924_s1, 256  ;;  %s2511_s30 = int_to_ptr.vmem [resolvable:$true] %s190_s30 }
   0xd   : > { %s2932_s25 = scalar_select %p2496_p3, 1, 0 }
   0xe   : > { %p2055_p5 = pneg %p2496_p3  ;;  %p2188_p7 = scmp.ne.s32.totalorder %s2924_s1, %s2187_s8 }
   0xf   : > { %p2194_p11 = scmp.lt.u32.totalorder %s2187_s8, %s2924_s1 }
  0x10   : > { %p2505_p6 = pnand %p2055_p5, %p2929_p1 }
  0x12   : > { %p2521_p8 = pneg %p2505_p6 }
  0x14   : > { %p2190_p9 = pnand %p2521_p8, %p2188_p7 }
  0x16   : > { %p2191_p10 = pneg %p2190_p9 }
  0x18   : > { %p2196_p12 = pnand %p2194_p11, %p2191_p10 }
  0x1a   : > { %2199 = shalt.err (!%p2196_p12)
}
  0x1b   : > { %s2200_s14 = scalar_lea.vmem %s2494_s23, 256  ;;  %p2208_p5 = scmp.lt.s32.totalorder %s2494_s23, %s2494_s23 }
  0x1c   : > { %p2201_p13 = scmp.ne.s32.totalorder %s2494_s23, %s2200_s14  ;;  %p2209_p4 = scmp.lt.s32.totalorder %s2200_s14, %s2200_s14 }
  0x1e   : > { %p2203_p0 = pnand %p2201_p13, %p2521_p8  ;;  %p2210_p7 = por %p2209_p4, %p2208_p5 }
  0x20   : > { %p2204_p2 = pneg %p2203_p0 }
  0x22   : > { %p2211_p9 = pnand %p2210_p7, %p2204_p2 }
  0x24   : > { %2214 = shalt.err (!%p2211_p9)
}
  0x25   : > { %s2408_s15 = smov 64   ;;  %s2409_s16 = smov 4  }
  0x26   : > { %2058 = dma.hbm_to_vmem [thread:$0]  (!%p2505_p6), %s2924_s1, 256, %s2494_s23, [#allocation6], %s2408_s15, %s2408_s15, %s2409_s16  }
  0x27   : > { %s2215_s6 = scalar_lea.hbm %s2926_s3, 256 }
  0x28   : > { %p2216_p4 = scmp.ne.s32.totalorder %s2926_s3, %s2215_s6  ;;  %p2222_p12 = scmp.lt.u32.totalorder %s2215_s6, %s2926_s3 }
  0x2a   : > { %p2218_p10 = pnand %p2216_p4, %p2521_p8 }
  0x2c   : > { %p2219_p11 = pneg %p2218_p10 }
  0x2e   : > { %p2224_p13 = pnand %p2222_p12, %p2219_p11 }
  0x30   : > { %2227 = shalt.err (!%p2224_p13)
}
  0x31   : > { %s2228_s23 = scalar_lea.vmem %s2509_s27, 256  ;;  %p2236_p7 = scmp.lt.s32.totalorder %s2509_s27, %s2509_s27 }
  0x32   : > { %p2229_p0 = scmp.ne.s32.totalorder %s2509_s27, %s2228_s23  ;;  %p2237_p9 = scmp.lt.s32.totalorder %s2228_s23, %s2228_s23 }
  0x34   : > { %p2231_p2 = pnand %p2229_p0, %p2521_p8  ;;  %p2238_p4 = por %p2237_p9, %p2236_p7 }
  0x36   : > { %p2232_p5 = pneg %p2231_p2 }
  0x38   : > { %p2239_p10 = pnand %p2238_p4, %p2232_p5 }
  0x3a   : > { %2242 = shalt.err (!%p2239_p10)
}
  0x3b   : > { %2064 = dma.hbm_to_vmem [thread:$0]  (!%p2505_p6), %s2926_s3, 256, %s2509_s27, [#allocation9], %s2408_s15, %s2408_s15, %s2409_s16  }
  0x3c   : > { %s2243_s22 = scalar_lea.hbm %s2925_s2, 16 }
  0x3d   : > { %p2244_p11 = scmp.ne.s32.totalorder %s2925_s2, %s2243_s22  ;;  %p2250_p0 = scmp.lt.u32.totalorder %s2243_s22, %s2925_s2 }
  0x3f   : > { %p2246_p12 = pnand %p2244_p11, %p2521_p8 }
  0x41   : > { %p2247_p13 = pneg %p2246_p12 }
  0x43   : > { %p2252_p2 = pnand %p2250_p0, %p2247_p13 }
  0x45   : > { %2255 = shalt.err (!%p2252_p2)
}
  0x46   : > { %s2256_s27 = scalar_lea.vmem %s2511_s30, 16  ;;  %s2263_s15 = scalar_lea.vmem %s2511_s30, 32 }
  0x47   : > { %p2257_p5 = scmp.ne.s32.totalorder %s2511_s30, %s2256_s27  ;;  %p2264_p4 = scmp.lt.s32.totalorder %s2511_s30, %s2511_s30 }
  0x48   : > { %p2265_p10 = scmp.lt.s32.totalorder %s2263_s15, %s2256_s27 }
  0x49   : > { %p2259_p7 = pnand %p2257_p5, %p2521_p8 }
  0x4a   : > { %p2266_p11 = por %p2265_p10, %p2264_p4 }
  0x4b   : > { %p2260_p9 = pneg %p2259_p7 }
  0x4d   : > { %p2267_p12 = pnand %p2266_p11, %p2260_p9 }
  0x4f   : > { %2270 = shalt.err (!%p2267_p12)
}
  0x50   : > { %2061 = dma.hbm_to_vmem [thread:$0]  (!%p2505_p6), %s2925_s2, 16, %s2511_s30, [#allocation6]  }
  0x51   : > { %s2410_s9 = smov [#allocation10]   ;;  %s2271_s13 = scalar_lea.hbm %s2927_s4, 16 }
  0x52   : > { %s214_s10 = sshll.u32 %s2410_s9, 4  ;;  %p2272_p13 = scmp.ne.s32.totalorder %s2927_s4, %s2271_s13  ;;  %s215_s10 = int_to_ptr.vmem [resolvable:$true] %s214_s10 }
  0x53   : > { %p2278_p5 = scmp.lt.u32.totalorder %s2271_s13, %s2927_s4 }
  0x54   : > { %p2274_p0 = pnand %p2272_p13, %p2521_p8 }
  0x56   : > { %p2275_p2 = pneg %p2274_p0 }
  0x58   : > { %p2280_p7 = pnand %p2278_p5, %p2275_p2 }
  0x5a   : > { %2283 = shalt.err (!%p2280_p7)
}
  0x5b   : > { %s2284_s30 = scalar_lea.vmem %s215_s10, 16  ;;  %s2291_s29 = scalar_lea.vmem %s215_s10, 32 }
  0x5c   : > { %p2285_p9 = scmp.ne.s32.totalorder %s215_s10, %s2284_s30  ;;  %p2292_p11 = scmp.lt.s32.totalorder %s215_s10, %s215_s10 }
  0x5d   : > { %p2293_p12 = scmp.lt.s32.totalorder %s2291_s29, %s2284_s30 }
  0x5e   : > { %p2287_p4 = pnand %p2285_p9, %p2521_p8 }
  0x5f   : > { %p2294_p1 = por %p2293_p12, %p2292_p11 }
  0x60   : > { %p2288_p10 = pneg %p2287_p4 }
  0x62   : > { %p2295_p3 = pnand %p2294_p1, %p2288_p10 }
  0x64   : > { %2298 = shalt.err (!%p2295_p3)
}
  0x65   : > { %2067 = dma.hbm_to_vmem [thread:$0]  (!%p2505_p6), %s2927_s4, 16, %s215_s10, [#allocation9]  }
  0x66   : > { %s1780_s11 = sadd.s32 4294967294, %s2403_s21   ;;  %s2609_s28 = sadd.s32 1, %s2403_s21  }
  0x67   : > { %s27_s27 = ssub.s32 %s2403_s21, %s2609_s28  ;;  %s30_s15 = sadd.s32 1, %s2399_s20 }
  0x68   : > { %p28_p1 = scmp.eq.s32.totalorder %s27_s27, 0  ;;  %p37_p3 = scmp.ne.s32.totalorder %s2399_s20, %s2395_s19 }
  0x69   : > { %p38_p8 = scmp.eq.s32.totalorder %s2403_s21, 0  ;;  %p43_p13 = scmp.ne.s32.totalorder %s2395_s19, %s2391_s18 }
  0x6a   : > { %s2620_s16 = scalar_select %p28_p1, %s2399_s20, %s30_s15  }
  0x6b   : > { %p2622_p0 = por %p38_p8, %p37_p3  ;;  %p2936_p2 = scmp.eq.s32.totalorder %s2489_s24, 0 }
  0x6c   : > { %p151_p5 = scmp.eq.s32.totalorder %s2489_s24, 1  ;;  %p157_p7 = scmp.eq.s32.totalorder %s1780_s11, 1 }
  0x6d   : > { %p2628_p6 = por %p2936_p2, %p43_p13  ;;  %p2080_p9 = scmp.lt.s32.totalorder %s2403_s21, 2 }
  0x6e   : > { %s225_s10 = sand.u32 1, %s2399_s20   ;;  %p2635_p4 = por %p151_p5, %p37_p3 }
  0x6f   : > { %p2639_p10 = por %p157_p7, %p43_p13  ;;  %s1787_s13 = sshll.u32 %s225_s10, 2 }
  0x70   : > { %s2938_s23 = scalar_select %p2635_p4, 1, 0 }
  0x71   : > { %s2939_s12 = scalar_select %p2639_p10, 1, 0 }
  0x72   : > { %s1788_s14 = sshll.u32 %s2403_s21, 6  ;;  %s229_s30 = scalar_lea.vmem [#allocation2], %s1787_s13 }
  0x73   : > { %s2647_s26 = scalar_lea.hbm %s2923_s0, %s1788_s14  ;;  %s236_s29 = sshll.u32 %s229_s30, 4  ;;  %s2649_s29 = int_to_ptr.vmem [resolvable:$true] %s236_s29 }
  0x74   : > { %p2653_p11 = pnand %p2080_p9, %p2622_p0  ;;  %s226_s7 = scalar_lea.sflag [#allocation3], %s225_s10 }
  0x75   : > { %s2299_s11 = scalar_lea.hbm %s2647_s26, 64  ;;  %s2304_s13 = scalar_lea.hbm %s2923_s0, 128 }
  0x76   : > { %p2300_p12 = scmp.ne.s32.totalorder %s2647_s26, %s2299_s11  ;;  %p2301_p1 = pneg %p2653_p11 }
  0x77   : > { %p2305_p13 = scmp.lt.u32.totalorder %s2647_s26, %s2923_s0  ;;  %p2306_p0 = scmp.lt.u32.totalorder %s2304_s13, %s2299_s11 }
  0x78   : > { %p2302_p3 = pnand %p2301_p1, %p2300_p12  ;;  %p2308_p5 = scmp.lt.u32.totalorder %s2299_s11, %s2647_s26 }
  0x79   : > { %p2307_p2 = por %p2306_p0, %p2305_p13 }
  0x7a   : > { %p2303_p8 = pneg %p2302_p3 }
  0x7b   : > { %p2309_p7 = por %p2308_p5, %p2307_p2 }
  0x7d   : > { %p2310_p9 = pnand %p2309_p7, %p2303_p8 }
  0x7f   : > { %2313 = shalt.err (!%p2310_p9)
}
  0x80   : > { %s2314_s10 = scalar_lea.vmem %s2649_s29, 64  ;;  %s2411_s17 = smov [#allocation2]  }
  0x81   : > { %p2315_p12 = scmp.ne.s32.totalorder %s2649_s29, %s2314_s10  ;;  %s2319_s22 = sshll.u32 %s2411_s17, 4  ;;  %s2320_s22 = int_to_ptr.vmem [resolvable:$false] %s2319_s22 }
  0x82   : > { %s2321_s30 = scalar_lea.vmem %s2320_s22, 128  ;;  %p2322_p4 = scmp.lt.s32.totalorder %s2649_s29, %s2320_s22 }
  0x83   : > { %p2317_p3 = pnand %p2315_p12, %p2301_p1  ;;  %p2323_p13 = scmp.lt.s32.totalorder %s2321_s30, %s2314_s10 }
  0x85   : > { %p2318_p10 = pneg %p2317_p3  ;;  %p2324_p0 = por %p2323_p13, %p2322_p4 }
  0x87   : > { %p2325_p2 = pnand %p2324_p0, %p2318_p10 }
  0x89   : > { %2328 = shalt.err (!%p2325_p2)
}
  0x8a   : > { %2071 = dma.hbm_to_vmem [thread:$0]  (!%p2653_p11), %s2647_s26, 64, %s2649_s29, %s226_s7  }
  0x8b   : > { %p2941_p8 = scmp.ne.s32.totalorder %s2932_s25, 0 }
  0x8c   : > { %s2685_s11 = sand.u32 (!%p2941_p8), 1, %s2395_s19  }
  0x8d   : > { %245 = sbr.rel (%p2941_p8) target bundleno = 3824 (0xef0), region = 40  ;;  %s1790_s27 = sshll.u32 (!%p2941_p8), %s2685_s11, 2 }
  0x8e   : > { %s248_s15 = scalar_lea.sflag (!%p2941_p8), [#allocation3], %s2685_s11  ;;  %s251_s13 = scalar_lea.vmem (!%p2941_p8), [#allocation2], %s1790_s27 }
  0x94   : > { %2374 = dma.done.wait (%p2628_p6), %s248_s15, 64  }
  0x95   : > { %2376 = vsyncadd (%p2628_p6), %s248_s15, 4294967232  ;;  %p2942_p4 = scmp.eq.s32.totalorder %s2489_s24, 0 }
  0x97   : > { %2378 = dma.done.wait (%p2942_p4), [#allocation6], 272   ;;  %p2943_p10 = pmov %p2942_p4 }
  0x98   : > { %p2944_p11 = pmov %p2942_p4 }
  0x99   : > { %2380 = vsyncadd (%p2943_p10), [#allocation6], 4294967024 }
  0x9a   : > { %2382 = dma.done.wait (%p2944_p11), [#allocation9], 272   ;;  %p2945_p1 = pmov %p2942_p4 }
  0x9b   : > { %v2412_v0 = vmov 0.0   ;;  %vm2413_vm0 = vmmov 0   ;;  %v2149_v1 = vld [vmem:[#allocation5] sm:$0xff]   ;;  %v2150_v2 = vld [vmem:[#allocation5 + $0x8] sm:$0xff]   ;;  %v295_v3 = vld [vmem:[%s251_s13] sm:$0xf] }
  0x9c   : > { %2384 = vsyncadd (%p2945_p1), [#allocation9], 4294967024  ;;  %1883 = vmatprep.subr.bf16.mxu0 %v2412_v0  ;;  %1887 = vmatprep.mubr.msk.bf16.mxu0 %vm2413_vm0, %v2412_v0  ;;  %vm312_vm1 = vcmask 261120   ;;  %s2414_s25 = smov 96   ;;  %s2415_s9 = smov 124   ;;  %vm362_vm2 = vcmask 31744  }
  0x9d   : > { %1891 = vmatprep.subr.bf16.mxu1 %v2412_v0  ;;  %1893 = vmatprep.mubr.msk.bf16.mxu1 %vm2413_vm0, %v2412_v0  ;;  %s2416_s26 = smov 92   ;;  %vm409_vm3 = vcmask 64512   ;;  %s2417_s29 = smov 60   ;;  %vm425_vm4 = vcmask 1043456   ;;  %v472_v43 = vld [vmem:[#allocation8] sm:$0x3] }
  0x9e   : > { %1884 = vmatpush3.bf16.msra.mxu0 %v2149_v1  ;;  %s2418_s6 = smov 64   ;;  %s2419_s7 = smov 88   ;;  %v2151_v42 = vld [vmem:[#allocation8] ss:$0 sps:$4 sm:$0xcc]   ;;  %vm593_vm5 = vcmask 1041408  }
  0x9f   : > { %1885 = vmatprep.subr.bf16.mxu0 %v2412_v0  ;;  %s2420_s8 = smov 120   ;;  %s2421_s14 = smov 84   ;;  %v641_v44 = vsel %vm593_vm5, %v472_v43, 0  ;;  %v589_v45 = vrot.slane %v2151_v42, 2 }
  0xa0   : > { %s2422_s10 = smov 56   ;;  %s2423_s17 = smov 116  }
  0xa1   : > { %v595_v46 = vsel %vm593_vm5, %v589_v45, 0  ;;  %s2424_s22 = smov 80   ;;  %s2425_s30 = smov 112  }
  0xa2   : > { %1886 = vmatpush3.bf16.msra.mxu0 %v2150_v2  ;;  %s2426_s27 = smov 52   ;;  %s2427_s15 = smov 48  }
  0xa3   : > { %1897 = vmatprep.subr.bf16.mxu0 %v2412_v0  ;;  %s2428_s13 = smov 108   ;;  %p2946_p5 = scmp.ne.s32.totalorder %s2938_s23, 0 }
  0xa5   : > { %1888 = vmatmul.mubr.msk.bf16.vlgmr.msra.gmra.mrb[0].mxu0 %vm312_vm1, %v295_v3 }
  0xa6   : > { %1899 = vmatprep.mubr.msk.bf16.mxu0 %vm2413_vm0, %v2412_v0 }
 0x178   : > { %v350_v4 = vpop.f32.mrb[0].mxu0 }
 0x179   : > { %v356_v5 = vmul.f32 0.5, %v350_v4  ;;  %v2712_v6 = vpack.c.bf16 %v350_v4, %v350_v4  ;;  %v1889_v7 = vpop.f32.mrb[1].mxu0 }
 0x17a   : > { %v353_v8 = vpop.f32.mrb[2].mxu0 }
 0x17b   : > { %v2714_v9 = vpack.c.bf16 %v356_v5, %v356_v5  ;;  %360 = vrot.lane.b32.xlu0 %v2712_v6, %s2414_s25  ;;  %v1890_v10 = vpop.f32.mrb[3].mxu0  ;;  %s2429_s25 = smov 76  }
 0x17d   : > { %474 = vrot.lane.b32.xlu1 %v2714_v9, %s2415_s9  ;;  %s2430_s9 = smov 72  }
 0x17f   : > { %476 = vrot.lane.b32.xlu0 %v2712_v6, %s2416_s26  ;;  %s2431_s26 = smov 104  }
 0x1ed   : > { %v361_v11 = vpop.permute.xlu0 %360 }
 0x1ee   : > { %v367_v12 = vsel %vm362_vm2, %v361_v11, 0 }
 0x1ef   : > { %1892 = vmatpush3.bf16.xpose.msra.mxu1 %v367_v12  ;;  %v475_v15 = vpop.permute.xlu1 %474 }
 0x1f0   : > { %1903 = vmatprep.subr.bf16.mxu1 %v2412_v0 }
 0x1f1   : > { %v477_v13 = vpop.permute.xlu0 %476 }
 0x1f2   : > { %v482_v14 = vsel %vm362_vm2, %v477_v13, 0 }
 0x1f6   : > { %1894 = vmatmul.mubr.msk.bf16.vlgmr.msra.gmra.mrb[0].mxu1 %vm362_vm2, %v2714_v9 }
 0x1f7   : > { %1904 = vmatpush3.bf16.xpose.msra.mxu1 %v482_v14  ;;  %1905 = vmatprep.mubr.msk.bf16.mxu1 %vm2413_vm0, %v2412_v0 }
 0x1f8   : > { %1915 = vmatprep.subr.bf16.mxu1 %v2412_v0 }
 0x1fe   : > { %1906 = vmatmul.mubr.msk.bf16.vlgmr.msra.gmra.mrb[4].mxu1 %vm362_vm2, %v475_v15 }
 0x1ff   : > { %1917 = vmatprep.mubr.msk.bf16.mxu1 %vm2413_vm0, %v2412_v0  ;;  %1916 = vmatpush3.bf16.msra.mxu1 %v595_v46 }
 0x200   : > { %1927 = vmatprep.subr.bf16.mxu1 %v2412_v0 }
 0x2c9   : > { %v403_v16 = vpop.f32.mrb[0].mxu1 }
 0x2ca   : > { %v1895_v17 = vpop.f32.mrb[1].mxu1  ;;  %v410_v18 = vsel %vm409_vm3, %v403_v16, -inf }
 0x2cb   : > { %411 = vmax.xlane.f32.xlu1 %v410_v18  ;;  %v406_v19 = vpop.f32.mrb[2].mxu1 }
 0x2cc   : > { %v1896_v20 = vpop.f32.mrb[3].mxu1 }
 0x2d1   : > { %v518_v21 = vpop.f32.mrb[4].mxu1 }
 0x2d2   : > { %v1907_v22 = vpop.f32.mrb[5].mxu1  ;;  %v524_v23 = vsel %vm409_vm3, %v518_v21, -inf }
 0x2d3   : > { %525 = vmax.xlane.f32.xlu0 %v524_v23  ;;  %v521_v24 = vpop.f32.mrb[6].mxu1 }
 0x2d4   : > { %v1908_v25 = vpop.f32.mrb[7].mxu1 }
 0x2dc   : > { %534 = vrot.lane.b32.xlu1 %v2712_v6, %s2417_s29  ;;  %s2432_s29 = smov 44  }
 0x2e9   : > { %420 = vrot.lane.b32.xlu0 %v2712_v6, %s2418_s6  ;;  %s2433_s6 = smov 40  }
 0x2ed   : > { %685 = vrot.lane.b32.xlu0 %v2712_v6, %s2419_s7  ;;  %s2434_s7 = smov 100  }
 0x2f1   : > { %683 = vrot.lane.b32.xlu0 %v2714_v9, %s2420_s8  ;;  %s2435_s8 = smov 68  }
 0x358   : > { %v412_v26 = vpop.xlane.xlu1 %411 }
 0x359   : > { %v413_v27 = vsub.f32 %v403_v16, %v412_v26 }
 0x35b   : > { %v414_v28 = vmul.f32 1.442695, %v413_v27 }
 0x35c   : > { %v535_v35 = vpop.permute.xlu1 %534 }
 0x35d   : > { %2155 = vpow2.f32 %v414_v28  ;;  %v540_v38 = vsel %vm425_vm4, %v535_v35, 0 }
 0x360   : > { %v526_v29 = vpop.xlane.xlu0 %525 }
 0x361   : > { %v527_v30 = vsub.f32 %v518_v21, %v526_v29 }
 0x363   : > { %v528_v31 = vmul.f32 1.442695, %v527_v30  ;;  %v794_v30 = vld [vmem:[#allocation8 + $0x4] sm:$0x3] }
 0x364   : > { %v421_v32 = vpop.permute.xlu0 %420 }
 0x365   : > { %2157 = vpow2.f32 %v528_v31  ;;  %v427_v33 = vsel %vm425_vm4, %v421_v32, 0  ;;  %v799_v31 = vsel %vm593_vm5, %v794_v30, 0 }
 0x366   : > { %1898 = vmatpush3.bf16.msra.mxu0 %v427_v33 }
 0x367   : > { %v2156_v34 = vpop.eup %2155  ;;  %1909 = vmatprep.subr.bf16.mxu0 %v2412_v0 }
 0x368   : > { %v416_v36 = vsel %vm409_vm3, %v2156_v34, 0.0  ;;  %v419_v37 = vpack.c.bf16 %v2156_v34, %v2156_v34  ;;  %v686_v47 = vpop.permute.xlu0 %685 }
 0x369   : > { %417 = vadd.xlane.f32.xlu0 %v416_v36  ;;  %v691_v2 = vsel %vm362_vm2, %v686_v47, 0 }
 0x36a   : > { %1900 = vmatmul.mubr.msk.bf16.vlgmr.msra.gmra.mrb[4].mxu0 %vm409_vm3, %v419_v37 }
 0x36b   : > { %1910 = vmatpush3.bf16.msra.mxu0 %v540_v38  ;;  %1911 = vmatprep.mubr.msk.bf16.mxu0 %vm2413_vm0, %v2412_v0 }
 0x36c   : > { %1921 = vmatprep.subr.bf16.mxu0 %v2412_v0  ;;  %v684_v48 = vpop.permute.xlu0 %683 }
 0x36f   : > { %v2158_v39 = vpop.eup %2157 }
 0x370   : > { %v530_v40 = vsel %vm409_vm3, %v2158_v39, 0.0  ;;  %v533_v41 = vpack.c.bf16 %v2158_v39, %v2158_v39 }
 0x371   : > { %531 = vadd.xlane.f32.xlu1 %v530_v40 }
 0x372   : > { %1912 = vmatmul.mubr.msk.bf16.vlgmr.msra.gmra.mrb[8].mxu0 %vm409_vm3, %v533_v41 }
 0x373   : > { %1923 = vmatprep.mubr.msk.bf16.mxu0 %vm2413_vm0, %v2412_v0  ;;  %1922 = vmatpush3.bf16.msra.mxu0 %v641_v44 }
 0x374   : > { %1933 = vmatprep.subr.bf16.mxu0 %v2412_v0 }
 0x37f   : > { %844 = vrot.lane.b32.xlu0 %v2712_v6, %s2421_s14  ;;  %s2436_s14 = smov 36  }
 0x3f6   : > { %v418_v49 = vpop.xlane.xlu0 %417 }
 0x3f7   : > { %2159 = vrcp.f32 %v418_v49 }
 0x3fa   : > { %v845_v25 = vpop.permute.xlu0 %844 }
 0x3fb   : > { %v850_v28 = vsel %vm362_vm2, %v845_v25, 0 }
 0x3fe   : > { %v532_v50 = vpop.xlane.xlu1 %531 }
 0x3ff   : > { %2161 = vrcp.f32 %v532_v50 }
 0x401   : > { %v2160_v51 = vpop.eup %2159 }
 0x409   : > { %v2162_v58 = vpop.eup %2161 }
 0x43d   : > { %v463_v52 = vpop.f32.mrb[4].mxu0 }
 0x43e   : > { %v470_v53 = vmul.f32 %v2160_v51, %v463_v52  ;;  %v1901_v54 = vpop.f32.mrb[5].mxu0 }
 0x43f   : > { %v466_v55 = vpop.f32.mrb[6].mxu0 }
 0x440   : > { %v471_v56 = vpack.c.bf16 %v470_v53, %v470_v53  ;;  %v1902_v57 = vpop.f32.mrb[7].mxu0 }
 0x442   : > { %1924 = vmatmul.mubr.msk.bf16.vlgmr.msra.gmra.mrb[12].mxu0 %vm362_vm2, %v471_v56 }
 0x443   : > { %1935 = vmatprep.mubr.msk.bf16.mxu0 %vm2413_vm0, %v2412_v0 }
 0x445   : > { %v576_v59 = vpop.f32.mrb[8].mxu0 }
 0x446   : > { %v583_v60 = vmul.f32 %v2162_v58, %v576_v59  ;;  %v1913_v61 = vpop.f32.mrb[9].mxu0 }
 0x447   : > { %v579_v62 = vpop.f32.mrb[10].mxu0  ;;  %v2152_v61 = vld [vmem:[#allocation8 + $0x4] ss:$0 sps:$4 sm:$0xcc]  }
 0x448   : > { %v584_v63 = vpack.c.bf16 %v583_v60, %v583_v60  ;;  %v1914_v1 = vpop.f32.mrb[11].mxu0  ;;  %v957_v62 = vrot.slane %v2152_v61, 2 }
 0x44a   : > { %1918 = vmatmul.mubr.msk.bf16.vlgmr.msra.gmra.mrb[8].mxu1 %vm362_vm2, %v584_v63  ;;  %v962_v63 = vsel %vm593_vm5, %v957_v62, 0 }
 0x44b   : > { %1928 = vmatpush3.bf16.xpose.msra.mxu1 %v691_v2  ;;  %1929 = vmatprep.mubr.msk.bf16.mxu1 %vm2413_vm0, %v2412_v0 }
 0x44c   : > { %1939 = vmatprep.subr.bf16.mxu1 %v2412_v0 }
 0x452   : > { %1930 = vmatmul.mubr.msk.bf16.vlgmr.msra.gmra.mrb[12].mxu1 %vm362_vm2, %v684_v48 }
 0x453   : > { %1941 = vmatprep.mubr.msk.bf16.mxu1 %vm2413_vm0, %v2412_v0  ;;  %1940 = vmatpush3.bf16.msra.mxu1 %v799_v31 }
 0x454   : > { %1951 = vmatprep.subr.bf16.mxu1 %v2412_v0 }
 0x515   : > { %v677_v3 = vpop.f32.mrb[12].mxu0 }
 0x516   : > { %v1925_v4 = vpop.f32.mrb[13].mxu0 }
 0x517   : > { %v680_v5 = vpop.f32.mrb[14].mxu0 }
 0x518   : > { %v1926_v7 = vpop.f32.mrb[15].mxu0 }
 0x51d   : > { %v631_v8 = vpop.f32.mrb[8].mxu1 }
 0x51e   : > { %v2764_v10 = vadd.f32 %v677_v3, %v631_v8  ;;  %v1919_v11 = vpop.f32.mrb[9].mxu1 }
 0x51f   : > { %v634_v12 = vpop.f32.mrb[10].mxu1 }
 0x520   : > { %v1920_v13 = vpop.f32.mrb[11].mxu1 }
 0x525   : > { %v727_v14 = vpop.f32.mrb[12].mxu1 }
 0x526   : > { %v1931_v15 = vpop.f32.mrb[13].mxu1  ;;  %v733_v16 = vsel %vm409_vm3, %v727_v14, -inf }
 0x527   : > { %734 = vmax.xlane.f32.xlu1 %v733_v16  ;;  %v730_v17 = vpop.f32.mrb[14].mxu1 }
 0x528   : > { %v1932_v18 = vpop.f32.mrb[15].mxu1 }
 0x538   : > { %743 = vrot.lane.b32.xlu1 %v2712_v6, %s2422_s10  ;;  %s1795_s10 = sshll.u32 %s2685_s11, 3 }
 0x53c   : > { %842 = vrot.lane.b32.xlu1 %v2714_v9, %s2423_s17  ;;  %s1829_s17 = sshll.u32 %s2489_s24, 7  ;;  %s1659_s24 = scalar_lea.sflag [#allocation4], %s2685_s11 }
 0x5b4   : > { %v735_v19 = vpop.xlane.xlu1 %734 }
 0x5b5   : > { %v736_v20 = vsub.f32 %v727_v14, %v735_v19 }
 0x5b7   : > { %v737_v21 = vmul.f32 1.442695, %v736_v20 }
 0x5b8   : > { %v744_v22 = vpop.permute.xlu1 %743 }
 0x5b9   : > { %2163 = vpow2.f32 %v737_v21  ;;  %v749_v23 = vsel %vm425_vm4, %v744_v22, 0 }
 0x5ba   : > { %1934 = vmatpush3.bf16.msra.mxu0 %v749_v23 }
 0x5bb   : > { %1945 = vmatprep.subr.bf16.mxu0 %v2412_v0 }
 0x5bc   : > { %v843_v29 = vpop.permute.xlu1 %842 }
 0x5c3   : > { %v2164_v24 = vpop.eup %2163 }
 0x5c4   : > { %v739_v26 = vsel %vm409_vm3, %v2164_v24, 0.0  ;;  %v742_v27 = vpack.c.bf16 %v2164_v24, %v2164_v24 }
 0x5c5   : > { %740 = vadd.xlane.f32.xlu1 %v739_v26 }
 0x5c6   : > { %1936 = vmatmul.mubr.msk.bf16.vlgmr.msra.gmra.mrb[16].mxu0 %vm409_vm3, %v742_v27 }
 0x5c7   : > { %1946 = vmatpush3.bf16.xpose.msra.mxu0 %v850_v28  ;;  %1947 = vmatprep.mubr.msk.bf16.mxu0 %vm2413_vm0, %v2412_v0 }
 0x5c8   : > { %1957 = vmatprep.subr.bf16.mxu0 %v2412_v0 }
 0x5ce   : > { %1948 = vmatmul.mubr.msk.bf16.vlgmr.msra.gmra.mrb[20].mxu0 %vm362_vm2, %v843_v29 }
 0x5cf   : > { %1959 = vmatprep.mubr.msk.bf16.mxu0 %vm2413_vm0, %v2412_v0  ;;  %1958 = vmatpush3.bf16.msra.mxu0 %v962_v63  ;;  %v2153_v63 = vld [vmem:[#allocation8 + $0x8] ss:$0 sps:$4 sm:$0xcc]  }
 0x5d0   : > { %1969 = vmatprep.subr.bf16.mxu0 %v2412_v0 }
 0x5d6   : > { %1007 = vrot.lane.b32.xlu1 %v2712_v6, %s2424_s22  ;;  %s293_s22 = scalar_lea.vmem [#allocation11], %s1795_s10 }
 0x5da   : > { %1005 = vrot.lane.b32.xlu1 %v2714_v9, %s2425_s30  ;;  %s1672_s30 = sshll.u32 %s293_s22, 4  ;;  %s2880_s30 = int_to_ptr.vmem [resolvable:$true] %s1672_s30 }
 0x652   : > { %v741_v32 = vpop.xlane.xlu1 %740 }
 0x653   : > { %2165 = vrcp.f32 %v741_v32  ;;  %v1116_v32 = vld [vmem:[#allocation8 + $0x8] sm:$0x3] }
 0x656   : > { %v1008_v51 = vpop.permute.xlu1 %1007 }
 0x657   : > { %v1013_v54 = vsel %vm362_vm2, %v1008_v51, 0 }
 0x65a   : > { %v1006_v55 = vpop.permute.xlu1 %1005 }
 0x65d   : > { %v2166_v33 = vpop.eup %2165 }
 0x699   : > { %v785_v34 = vpop.f32.mrb[16].mxu0 }
 0x69a   : > { %v792_v35 = vmul.f32 %v2166_v33, %v785_v34  ;;  %v1937_v36 = vpop.f32.mrb[17].mxu0  ;;  %v1121_v33 = vsel %vm593_vm5, %v1116_v32, 0 }
 0x69b   : > { %v788_v37 = vpop.f32.mrb[18].mxu0 }
 0x69c   : > { %v793_v38 = vpack.c.bf16 %v792_v35, %v792_v35  ;;  %v1938_v39 = vpop.f32.mrb[19].mxu0 }
 0x69e   : > { %1942 = vmatmul.mubr.msk.bf16.vlgmr.msra.gmra.mrb[16].mxu1 %vm362_vm2, %v793_v38 }
 0x69f   : > { %1953 = vmatprep.mubr.msk.bf16.mxu1 %vm2413_vm0, %v2412_v0 }
 0x6a1   : > { %v886_v40 = vpop.f32.mrb[20].mxu0 }
 0x6a2   : > { %v1949_v41 = vpop.f32.mrb[21].mxu0  ;;  %v892_v42 = vsel %vm409_vm3, %v886_v40, -inf }
 0x6a3   : > { %893 = vmax.xlane.f32.xlu0 %v892_v42  ;;  %v889_v43 = vpop.f32.mrb[22].mxu0 }
 0x6a4   : > { %v1950_v44 = vpop.f32.mrb[23].mxu0 }
 0x6b9   : > { %902 = vrot.lane.b32.xlu0 %v2712_v6, %s2426_s27 }
 0x730   : > { %v894_v45 = vpop.xlane.xlu0 %893 }
 0x731   : > { %v895_v46 = vsub.f32 %v886_v40, %v894_v45 }
 0x733   : > { %v896_v47 = vmul.f32 1.442695, %v895_v46 }
 0x734   : > { %v903_v48 = vpop.permute.xlu0 %902 }
 0x735   : > { %2167 = vpow2.f32 %v896_v47  ;;  %v908_v49 = vsel %vm425_vm4, %v903_v48, 0 }
 0x736   : > { %1952 = vmatpush3.bf16.msra.mxu1 %v908_v49 }
 0x737   : > { %1963 = vmatprep.subr.bf16.mxu1 %v2412_v0 }
 0x73f   : > { %v2168_v50 = vpop.eup %2167 }
 0x740   : > { %v898_v52 = vsel %vm409_vm3, %v2168_v50, 0.0  ;;  %v901_v53 = vpack.c.bf16 %v2168_v50, %v2168_v50 }
 0x741   : > { %899 = vadd.xlane.f32.xlu0 %v898_v52 }
 0x742   : > { %1954 = vmatmul.mubr.msk.bf16.vlgmr.msra.gmra.mrb[20].mxu1 %vm409_vm3, %v901_v53 }
 0x743   : > { %1964 = vmatpush3.bf16.xpose.msra.mxu1 %v1013_v54  ;;  %1965 = vmatprep.mubr.msk.bf16.mxu1 %vm2413_vm0, %v2412_v0 }
 0x744   : > { %1975 = vmatprep.subr.bf16.mxu1 %v2412_v0 }
 0x74a   : > { %1966 = vmatmul.mubr.msk.bf16.vlgmr.msra.gmra.mrb[24].mxu1 %vm362_vm2, %v1006_v55 }
 0x74b   : > { %1977 = vmatprep.mubr.msk.bf16.mxu1 %vm2413_vm0, %v2412_v0  ;;  %1976 = vmatpush3.bf16.msra.mxu1 %v1121_v33  ;;  %v1438_v33 = vld [vmem:[#allocation8 + $0xc] sm:$0x3] }
 0x74c   : > { %1987 = vmatprep.subr.bf16.mxu1 %v2412_v0 }
 0x757   : > { %1065 = vrot.lane.b32.xlu0 %v2712_v6, %s2427_s15 }
 0x75b   : > { %1164 = vrot.lane.b32.xlu0 %v2714_v9, %s2428_s13  ;;  %s2878_s13 = scalar_lea.hbm %s2928_s5, %s1829_s17 }
 0x771   : > { %v835_v56 = vpop.f32.mrb[16].mxu1 }
 0x772   : > { %v841_v57 = vadd.f32 %v835_v56, %v2764_v10  ;;  %v1943_v58 = vpop.f32.mrb[17].mxu1 }
 0x773   : > { %v838_v59 = vpop.f32.mrb[18].mxu1 }
 0x774   : > { %v1944_v60 = vpop.f32.mrb[19].mxu1 }
 0x7ce   : > { %v900_v1 = vpop.xlane.xlu0 %899 }
 0x7cf   : > { %2169 = vrcp.f32 %v900_v1  ;;  %v1279_v1 = vrot.slane %v2153_v63, 2 }
 0x7d2   : > { %v1066_v7 = vpop.permute.xlu0 %1065 }
 0x7d3   : > { %v1071_v12 = vsel %vm425_vm4, %v1066_v7, 0 }
 0x7d6   : > { %v1165_v26 = vpop.permute.xlu0 %1164 }
 0x7d9   : > { %v2170_v2 = vpop.eup %2169 }
 0x815   : > { %v944_v3 = vpop.f32.mrb[20].mxu1 }
 0x816   : > { %v951_v4 = vmul.f32 %v2170_v2, %v944_v3  ;;  %v1955_v5 = vpop.f32.mrb[21].mxu1  ;;  %v1284_v2 = vsel %vm593_vm5, %v1279_v1, 0 }
 0x817   : > { %v947_v8 = vpop.f32.mrb[22].mxu1 }
 0x818   : > { %v952_v11 = vpack.c.bf16 %v951_v4, %v951_v4  ;;  %v1956_v10 = vpop.f32.mrb[23].mxu1 }
 0x81a   : > { %1960 = vmatmul.mubr.msk.bf16.vlgmr.msra.gmra.mrb[24].mxu0 %vm362_vm2, %v952_v11 }
 0x81b   : > { %1970 = vmatpush3.bf16.msra.mxu0 %v1071_v12  ;;  %1971 = vmatprep.mubr.msk.bf16.mxu0 %vm2413_vm0, %v2412_v0 }
 0x81c   : > { %1981 = vmatprep.subr.bf16.mxu0 %v2412_v0 }
 0x81d   : > { %v1049_v13 = vpop.f32.mrb[24].mxu1 }
 0x81e   : > { %v1967_v14 = vpop.f32.mrb[25].mxu1  ;;  %v1055_v15 = vsel %vm409_vm3, %v1049_v13, -inf }
 0x81f   : > { %1056 = vmax.xlane.f32.xlu1 %v1055_v15  ;;  %v1052_v16 = vpop.f32.mrb[26].mxu1 }
 0x820   : > { %v1968_v17 = vpop.f32.mrb[27].mxu1 }
 0x830   : > { %1166 = vrot.lane.b32.xlu1 %v2712_v6, %s2429_s25  ;;  %s2329_s25 = scalar_lea.vmem %s2880_s30, 128 }
 0x831   : > { %p2330_p6 = scmp.ne.s32.totalorder %s2880_s30, %s2329_s25 }
 0x833   : > { %p2331_p7 = pnand %p2330_p6, %p2946_p5 }
 0x835   : > { %p2332_p9 = pneg %p2331_p7 }
 0x8ac   : > { %v1057_v18 = vpop.xlane.xlu1 %1056 }
 0x8ad   : > { %v1058_v19 = vsub.f32 %v1049_v13, %v1057_v18 }
 0x8af   : > { %v1059_v20 = vmul.f32 1.442695, %v1058_v19 }
 0x8b0   : > { %v1167_v22 = vpop.permute.xlu1 %1166 }
 0x8b1   : > { %2171 = vpow2.f32 %v1059_v20  ;;  %v1172_v25 = vsel %vm362_vm2, %v1167_v22, 0 }
 0x8bb   : > { %v2172_v21 = vpop.eup %2171 }
 0x8bc   : > { %v1061_v23 = vsel %vm409_vm3, %v2172_v21, 0.0  ;;  %v1064_v24 = vpack.c.bf16 %v2172_v21, %v2172_v21 }
 0x8bd   : > { %1062 = vadd.xlane.f32.xlu1 %v1061_v23 }
 0x8be   : > { %1972 = vmatmul.mubr.msk.bf16.vlgmr.msra.gmra.mrb[28].mxu0 %vm409_vm3, %v1064_v24 }
 0x8bf   : > { %1982 = vmatpush3.bf16.xpose.msra.mxu0 %v1172_v25  ;;  %1983 = vmatprep.mubr.msk.bf16.mxu0 %vm2413_vm0, %v2412_v0 }
 0x8c0   : > { %1993 = vmatprep.subr.bf16.mxu0 %v2412_v0 }
 0x8c6   : > { %1984 = vmatmul.mubr.msk.bf16.vlgmr.msra.gmra.mrb[32].mxu0 %vm362_vm2, %v1165_v26 }
 0x8c7   : > { %1995 = vmatprep.mubr.msk.bf16.mxu0 %vm2413_vm0, %v2412_v0  ;;  %1994 = vmatpush3.bf16.msra.mxu0 %v1284_v2 }
 0x8c8   : > { %2005 = vmatprep.subr.bf16.mxu0 %v2412_v0 }
 0x8ce   : > { %1329 = vrot.lane.b32.xlu1 %v2712_v6, %s2430_s9  ;;  %s2437_s9 = smov [#allocation11]  }
 0x8d2   : > { %1327 = vrot.lane.b32.xlu1 %v2714_v9, %s2431_s26  ;;  %s2333_s26 = sshll.u32 %s2437_s9, 4  ;;  %s2334_s26 = int_to_ptr.vmem [resolvable:$false] %s2333_s26 }
 0x8d3   : > { %p2336_p12 = scmp.lt.s32.totalorder %s2880_s30, %s2334_s26 }
 0x8ed   : > { %v998_v27 = vpop.f32.mrb[24].mxu0 }
 0x8ee   : > { %v1004_v28 = vadd.f32 %v998_v27, %v841_v57  ;;  %v1961_v29 = vpop.f32.mrb[25].mxu0 }
 0x8ef   : > { %v1001_v30 = vpop.f32.mrb[26].mxu0 }
 0x8f0   : > { %v1962_v31 = vpop.f32.mrb[27].mxu0 }
 0x94a   : > { %v1063_v34 = vpop.xlane.xlu1 %1062 }
 0x94b   : > { %2173 = vrcp.f32 %v1063_v34  ;;  %v1443_v34 = vsel %vm593_vm5, %v1438_v33, 0 }
 0x94e   : > { %v1330_v53 = vpop.permute.xlu1 %1329 }
 0x94f   : > { %v1335_v56 = vsel %vm362_vm2, %v1330_v53, 0 }
 0x952   : > { %v1328_v57 = vpop.permute.xlu1 %1327 }
 0x955   : > { %v2174_v35 = vpop.eup %2173 }
 0x991   : > { %v1107_v36 = vpop.f32.mrb[28].mxu0 }
 0x992   : > { %v1114_v37 = vmul.f32 %v2174_v35, %v1107_v36  ;;  %v1973_v38 = vpop.f32.mrb[29].mxu0 }
 0x993   : > { %v1110_v39 = vpop.f32.mrb[30].mxu0 }
 0x994   : > { %v1115_v40 = vpack.c.bf16 %v1114_v37, %v1114_v37  ;;  %v1974_v41 = vpop.f32.mrb[31].mxu0 }
 0x996   : > { %1978 = vmatmul.mubr.msk.bf16.vlgmr.msra.gmra.mrb[28].mxu1 %vm362_vm2, %v1115_v40 }
 0x997   : > { %1989 = vmatprep.mubr.msk.bf16.mxu1 %vm2413_vm0, %v2412_v0 }
 0x999   : > { %v1208_v42 = vpop.f32.mrb[32].mxu0 }
 0x99a   : > { %v1985_v43 = vpop.f32.mrb[33].mxu0  ;;  %v1214_v44 = vsel %vm409_vm3, %v1208_v42, -inf }
 0x99b   : > { %1215 = vmax.xlane.f32.xlu0 %v1214_v44  ;;  %v1211_v45 = vpop.f32.mrb[34].mxu0 }
 0x99c   : > { %v1986_v46 = vpop.f32.mrb[35].mxu0 }
 0x9b1   : > { %1224 = vrot.lane.b32.xlu0 %v2712_v6, %s2432_s29  ;;  %s2335_s29 = scalar_lea.vmem %s2334_s26, 256 }
 0x9b2   : > { %p2337_p3 = scmp.lt.s32.totalorder %s2335_s29, %s2329_s25 }
 0x9b4   : > { %p2338_p13 = por %p2337_p3, %p2336_p12 }
 0x9b6   : > { %p2339_p0 = pnand %p2338_p13, %p2332_p9 }
 0xa28   : > { %v1216_v47 = vpop.xlane.xlu0 %1215 }
 0xa29   : > { %v1217_v48 = vsub.f32 %v1208_v42, %v1216_v47 }
 0xa2b   : > { %v1218_v49 = vmul.f32 1.442695, %v1217_v48 }
 0xa2c   : > { %v1225_v50 = vpop.permute.xlu0 %1224 }
 0xa2d   : > { %2175 = vpow2.f32 %v1218_v49  ;;  %v1230_v51 = vsel %vm425_vm4, %v1225_v50, 0 }
 0xa2e   : > { %1988 = vmatpush3.bf16.msra.mxu1 %v1230_v51 }
 0xa2f   : > { %1999 = vmatprep.subr.bf16.mxu1 %v2412_v0 }
 0xa37   : > { %v2176_v52 = vpop.eup %2175 }
 0xa38   : > { %v1220_v54 = vsel %vm409_vm3, %v2176_v52, 0.0  ;;  %v1223_v55 = vpack.c.bf16 %v2176_v52, %v2176_v52 }
 0xa39   : > { %1221 = vadd.xlane.f32.xlu0 %v1220_v54 }
 0xa3a   : > { %1990 = vmatmul.mubr.msk.bf16.vlgmr.msra.gmra.mrb[32].mxu1 %vm409_vm3, %v1223_v55 }
 0xa3b   : > { %2000 = vmatpush3.bf16.xpose.msra.mxu1 %v1335_v56  ;;  %2001 = vmatprep.mubr.msk.bf16.mxu1 %vm2413_vm0, %v2412_v0 }
 0xa3c   : > { %2011 = vmatprep.subr.bf16.mxu1 %v2412_v0 }
 0xa42   : > { %2002 = vmatmul.mubr.msk.bf16.vlgmr.msra.gmra.mrb[36].mxu1 %vm362_vm2, %v1328_v57 }
 0xa43   : > { %2013 = vmatprep.mubr.msk.bf16.mxu1 %vm2413_vm0, %v2412_v0  ;;  %2012 = vmatpush3.bf16.msra.mxu1 %v1443_v34 }
 0xa44   : > { %2023 = vmatprep.subr.bf16.mxu1 %v2412_v0 }
 0xa4f   : > { %1387 = vrot.lane.b32.xlu0 %v2712_v6, %s2433_s6 }
 0xa53   : > { %1486 = vrot.lane.b32.xlu0 %v2714_v9, %s2434_s7 }
 0xa69   : > { %v1157_v58 = vpop.f32.mrb[28].mxu1 }
 0xa6a   : > { %v1163_v59 = vadd.f32 %v1157_v58, %v1004_v28  ;;  %v1979_v60 = vpop.f32.mrb[29].mxu1 }
 0xa6b   : > { %v1160_v61 = vpop.f32.mrb[30].mxu1 }
 0xa6c   : > { %v1980_v62 = vpop.f32.mrb[31].mxu1 }
 0xac6   : > { %v1222_v3 = vpop.xlane.xlu0 %1221 }
 0xac7   : > { %2177 = vrcp.f32 %v1222_v3 }
 0xaca   : > { %v1388_v11 = vpop.permute.xlu0 %1387 }
 0xacb   : > { %v1393_v13 = vsel %vm425_vm4, %v1388_v11, 0  ;;  %v1827_v11 = vld [vmem:[#allocation10] ss:$0 sm:$0xff] }
 0xace   : > { %v1487_v27 = vpop.permute.xlu0 %1486 }
 0xad1   : > { %v2178_v4 = vpop.eup %2177 }
 0xb0d   : > { %v1266_v5 = vpop.f32.mrb[32].mxu1 }
 0xb0e   : > { %v1273_v7 = vmul.f32 %v2178_v4, %v1266_v5  ;;  %v1991_v8 = vpop.f32.mrb[33].mxu1 }
 0xb0f   : > { %v1269_v9 = vpop.f32.mrb[34].mxu1 }
 0xb10   : > { %v1274_v10 = vpack.c.bf16 %v1273_v7, %v1273_v7  ;;  %v1992_v12 = vpop.f32.mrb[35].mxu1 }
 0xb12   : > { %1996 = vmatmul.mubr.msk.bf16.vlgmr.msra.gmra.mrb[36].mxu0 %vm362_vm2, %v1274_v10 }
 0xb13   : > { %2006 = vmatpush3.bf16.msra.mxu0 %v1393_v13  ;;  %2007 = vmatprep.mubr.msk.bf16.mxu0 %vm2413_vm0, %v2412_v0 }
 0xb14   : > { %2017 = vmatprep.subr.bf16.mxu0 %v2412_v0 }
 0xb15   : > { %v1371_v14 = vpop.f32.mrb[36].mxu1 }
 0xb16   : > { %v2003_v15 = vpop.f32.mrb[37].mxu1  ;;  %v1377_v16 = vsel %vm409_vm3, %v1371_v14, -inf }
 0xb17   : > { %1378 = vmax.xlane.f32.xlu1 %v1377_v16  ;;  %v1374_v17 = vpop.f32.mrb[38].mxu1 }
 0xb18   : > { %v2004_v18 = vpop.f32.mrb[39].mxu1 }
 0xb28   : > { %1488 = vrot.lane.b32.xlu1 %v2712_v6, %s2435_s8 }
 0xba4   : > { %v1379_v19 = vpop.xlane.xlu1 %1378 }
 0xba5   : > { %v1380_v20 = vsub.f32 %v1371_v14, %v1379_v19 }
 0xba7   : > { %v1381_v21 = vmul.f32 1.442695, %v1380_v20 }
 0xba8   : > { %v1489_v23 = vpop.permute.xlu1 %1488 }
 0xba9   : > { %2179 = vpow2.f32 %v1381_v21  ;;  %v1494_v26 = vsel %vm362_vm2, %v1489_v23, 0 }
 0xbb3   : > { %v2180_v22 = vpop.eup %2179 }
 0xbb4   : > { %v1383_v24 = vsel %vm409_vm3, %v2180_v22, 0.0  ;;  %v1386_v25 = vpack.c.bf16 %v2180_v22, %v2180_v22 }
 0xbb5   : > { %1384 = vadd.xlane.f32.xlu1 %v1383_v24 }
 0xbb6   : > { %2008 = vmatmul.mubr.msk.bf16.vlgmr.msra.gmra.mrb[40].mxu0 %vm409_vm3, %v1386_v25 }
 0xbb7   : > { %2018 = vmatpush3.bf16.xpose.msra.mxu0 %v1494_v26  ;;  %2019 = vmatprep.mubr.msk.bf16.mxu0 %vm2413_vm0, %v2412_v0 }
 0xbb8   : > { %2029 = vmatprep.subr.bf16.mxu0 %v2412_v0 }
 0xbbe   : > { %2020 = vmatmul.mubr.msk.bf16.vlgmr.msra.gmra.mrb[44].mxu0 %vm362_vm2, %v1487_v27 }
 0xbbf   : > { %2031 = vmatprep.mubr.msk.bf16.mxu0 %vm2413_vm0, %v2412_v0 }
 0xbe5   : > { %v1320_v28 = vpop.f32.mrb[36].mxu0 }
 0xbe6   : > { %v1326_v29 = vadd.f32 %v1320_v28, %v1163_v59  ;;  %v1997_v30 = vpop.f32.mrb[37].mxu0  ;;  %v2154_v59 = vld [vmem:[#allocation8 + $0xc] ss:$0 sps:$4 sm:$0xcc]  }
 0xbe7   : > { %v1323_v31 = vpop.f32.mrb[38].mxu0  ;;  %v1601_v60 = vrot.slane %v2154_v59, 2 }
 0xbe8   : > { %v1998_v32 = vpop.f32.mrb[39].mxu0 }
 0xbe9   : > { %v1606_v61 = vsel %vm593_vm5, %v1601_v60, 0 }
 0xbea   : > { %2030 = vmatpush3.bf16.msra.mxu0 %v1606_v61 }
 0xc42   : > { %v1385_v35 = vpop.xlane.xlu1 %1384 }
 0xc43   : > { %2181 = vrcp.f32 %v1385_v35 }
 0xc4d   : > { %v2182_v36 = vpop.eup %2181 }
 0xc89   : > { %v1429_v37 = vpop.f32.mrb[40].mxu0 }
 0xc8a   : > { %v1436_v38 = vmul.f32 %v2182_v36, %v1429_v37  ;;  %v2009_v39 = vpop.f32.mrb[41].mxu0 }
 0xc8b   : > { %v1432_v40 = vpop.f32.mrb[42].mxu0 }
 0xc8c   : > { %v1437_v41 = vpack.c.bf16 %v1436_v38, %v1436_v38  ;;  %v2010_v42 = vpop.f32.mrb[43].mxu0 }
 0xc8e   : > { %2014 = vmatmul.mubr.msk.bf16.vlgmr.msra.gmra.mrb[40].mxu1 %vm362_vm2, %v1437_v41 }
 0xc8f   : > { %2025 = vmatprep.mubr.msk.bf16.mxu1 %vm2413_vm0, %v2412_v0 }
 0xc91   : > { %v1530_v43 = vpop.f32.mrb[44].mxu0 }
 0xc92   : > { %v2021_v44 = vpop.f32.mrb[45].mxu0  ;;  %v1536_v45 = vsel %vm409_vm3, %v1530_v43, -inf }
 0xc93   : > { %1537 = vmax.xlane.f32.xlu0 %v1536_v45  ;;  %v1533_v46 = vpop.f32.mrb[46].mxu0 }
 0xc94   : > { %v2022_v47 = vpop.f32.mrb[47].mxu0 }
 0xca9   : > { %1546 = vrot.lane.b32.xlu0 %v2712_v6, %s2436_s14 }
 0xd20   : > { %v1538_v48 = vpop.xlane.xlu0 %1537 }
 0xd21   : > { %v1539_v49 = vsub.f32 %v1530_v43, %v1538_v48 }
 0xd23   : > { %v1540_v50 = vmul.f32 1.442695, %v1539_v49 }
 0xd24   : > { %v1547_v51 = vpop.permute.xlu0 %1546 }
 0xd25   : > { %2183 = vpow2.f32 %v1540_v50  ;;  %v1552_v52 = vsel %vm425_vm4, %v1547_v51, 0 }
 0xd26   : > { %2024 = vmatpush3.bf16.msra.mxu1 %v1552_v52 }
 0xd2f   : > { %v2184_v53 = vpop.eup %2183 }
 0xd30   : > { %v1542_v0 = vsel %vm409_vm3, %v2184_v53, 0.0  ;;  %v1545_v54 = vpack.c.bf16 %v2184_v53, %v2184_v53 }
 0xd31   : > { %1543 = vadd.xlane.f32.xlu1 %v1542_v0 }
 0xd32   : > { %2026 = vmatmul.mubr.msk.bf16.vlgmr.msra.gmra.mrb[44].mxu1 %vm409_vm3, %v1545_v54 }
 0xd61   : > { %v1479_v55 = vpop.f32.mrb[40].mxu1 }
 0xd62   : > { %v1485_v56 = vadd.f32 %v1479_v55, %v1326_v29  ;;  %v2015_v57 = vpop.f32.mrb[41].mxu1 }
 0xd63   : > { %v1482_v58 = vpop.f32.mrb[42].mxu1 }
 0xd64   : > { %v2016_v6 = vpop.f32.mrb[43].mxu1 }
 0xdbe   : > { %v1544_v62 = vpop.xlane.xlu1 %1543 }
 0xdbf   : > { %2185 = vrcp.f32 %v1544_v62 }
 0xdc9   : > { %v2186_v63 = vpop.eup %2185 }
 0xe05   : > { %v1588_v1 = vpop.f32.mrb[44].mxu1 }
 0xe06   : > { %v1595_v2 = vmul.f32 %v2186_v63, %v1588_v1  ;;  %v2027_v3 = vpop.f32.mrb[45].mxu1 }
 0xe07   : > { %v1591_v4 = vpop.f32.mrb[46].mxu1 }
 0xe08   : > { %v1596_v5 = vpack.c.bf16 %v1595_v2, %v1595_v2  ;;  %v2028_v7 = vpop.f32.mrb[47].mxu1 }
 0xe0a   : > { %2032 = vmatmul.mubr.msk.bf16.vlgmr.msra.gmra.mrb[48].mxu0 %vm362_vm2, %v1596_v5 }
 0xedd   : > { %v1642_v8 = vpop.f32.mrb[48].mxu0 }
 0xede   : > { %v1648_v9 = vadd.f32 %v1642_v8, %v1485_v56  ;;  %v2033_v10 = vpop.f32.mrb[49].mxu0 }
 0xedf   : > { %v1645_v12 = vpop.f32.mrb[50].mxu0 }
 0xee0   : > { %v1656_v13 = vadd.f32 %v1827_v11, %v1648_v9  ;;  %v2034_v14 = vpop.f32.mrb[51].mxu0 }
 0xee2   : > { %1657 = vst.msk [vmem:[%s293_s22] sm:$0xff] %vm312_vm1, %v1656_v13 }
 0xee3   : > { %2342 = shalt.err (!%p2339_p0)
}
 0xee4   : > { %s2343_s11 = scalar_lea.hbm %s2878_s13, 128  ;;  %s2347_s8 = scalar_lea.hbm %s2928_s5, 256 }
 0xee5   : > { %p2344_p2 = scmp.ne.s32.totalorder %s2878_s13, %s2343_s11  ;;  %p2348_p10 = scmp.lt.u32.totalorder %s2878_s13, %s2928_s5 }
 0xee6   : > { %p2349_p11 = scmp.lt.u32.totalorder %s2347_s8, %s2343_s11  ;;  %p2351_p6 = scmp.lt.u32.totalorder %s2343_s11, %s2878_s13 }
 0xee7   : > { %p2345_p8 = pnand %p2344_p2, %p2946_p5 }
 0xee8   : > { %p2350_p1 = por %p2349_p11, %p2348_p10 }
 0xee9   : > { %p2346_p4 = pneg %p2345_p8 }
 0xeea   : > { %p2352_p7 = por %p2351_p6, %p2350_p1 }
 0xeec   : > { %p2353_p9 = pnand %p2352_p7, %p2346_p4 }
 0xeee   : > { %2356 = shalt.err (!%p2353_p9)
}
 0xeef   : > { %2053 = dma.vmem_to_hbm [thread:$0]  (%p2946_p5), %s2880_s30, 128, %s2878_s13, %s1659_s24  }
 0xef0 PF: > { %s1684_s17 = sand.u32 1, %s2391_s18   ;;  %p2947_p12 = scmp.ne.s32.totalorder %s2939_s12, 0 }
 0xef1   : > { %p2948_p3 = scmp.ge.s32.totalorder %s2403_s21, 2  ;;  %s1685_s22 = scalar_lea.sflag [#allocation4], %s1684_s17 }
 0xef3   : > { %p2073_p13 = pnand %p2948_p3, %p2947_p12 }
 0xef5   : > { %2386 = dma.done.wait (!%p2073_p13), %s1685_s22, 128  }
 0xef6   : > { %2388 = vsyncadd (!%p2073_p13), %s1685_s22, 4294967168  ;;  %p20_p0 = scmp.ge.s32.totalorder %s2609_s28, 4   ;;  %s2949_s18 = smov %s2395_s19 }
 0xef7   : > { %s2950_s19 = smov %s2399_s20  ;;  %s2951_s20 = smov %s2620_s16 }
 0xef8   : > { %s2952_s21 = smov %s2609_s28  ;;  %22 = sbr.rel (!%p20_p0) target bundleno = 7 (0x7), region = 101 }
 0xeff   :  { %1690 = vsyncpa [#allocation3], 1 }
 0xf00   :  { %1692 = vsyncpa [#allocation3 + $0x1], 1 }
 0xf01   :  { %1693 = vsyncpa [#allocation6], 1 }
 0xf02   :  { %1694 = vsyncpa [#allocation9], 1 }
 0xf03   :  { %1695 = vsyncpa [#allocation4], 1 }
 0xf04   :  { %1697 = vsyncpa [#allocation4 + $0x1], 1 }

</bundles_post_ra>
